<compile_context>
chip_gen: v7x
topology: tpu7x:2x2x1
jax: 0.10.0
libtpu: 0.0.40
codegen_flags: <defaults>
</compile_context>

<pallas_src>
import math

import jax
import jax.numpy as jnp
from jax.experimental import pallas as pl
from jax.experimental.pallas import tpu as pltpu

CLASSES = 3
NUM_COLORS = 3
LEAKY_SLOPE = 0.01   # PyTorch nn.LeakyReLU default
LANE = 128           # lane-dense output slab width
COLOR_OFF = 64       # lane offset of the color-predictor result in the slab

N_CLS_LAYERS = 9
N_COL_LAYERS = 4


# ---------------------------------------------------------------------------
# Fused kernel: one program per batch tile, both branches in one body
# ---------------------------------------------------------------------------
def _fused_kernel(x0_ref, x1_ref, *refs):
    out_ref = refs[-1]                         # (tile_b, 128) f32
    params = refs[:-1]
    cls_p = params[: 2 * N_CLS_LAYERS]         # w0,b0,...,w8,b8  (weights bf16)
    col_p = params[2 * N_CLS_LAYERS:]          # w0,b0,...,w3,b3

    def lin(h, w_ref, b_ref):
        # bf16 x bf16 on the MXU, f32 accumulation, f32 bias add.
        return jnp.dot(h, w_ref[...], preferred_element_type=jnp.float32) + b_ref[...]

    def lrelu(y):                              # f32 in -> bf16 out (maps 0 -> 0)
        return jnp.where(y > 0, y, LEAKY_SLOPE * y).astype(jnp.bfloat16)

    def relu(y):                               # f32 in -> bf16 out (maps 0 -> 0)
        return jnp.maximum(y, 0.0).astype(jnp.bfloat16)

    # ---- classifier branch -------------------------------------------------
    h = x0_ref[...].astype(jnp.bfloat16)
    # inner Sequential: 4 x (Linear(., 128) + LeakyReLU)
    for i in range(4):
        h = lrelu(lin(h, cls_p[2 * i], cls_p[2 * i + 1]))
    # outer LeakyReLU applied on top of the inner block's output (matches the
    # PyTorch Sequential structure: negatives get slope^2).  h stays bf16.
    h = jnp.where(h > 0, h, LEAKY_SLOPE * h)
    # 128->384, 384->384, 384->128, 128->16 (each + LeakyReLU), all unpadded
    for i in range(4, 8):
        h = lrelu(lin(h, cls_p[2 * i], cls_p[2 * i + 1]))
    # 16 -> CLASSES; weight/bias cols zero-padded to 128 lanes (lanes 0:3 real).
    logits_pad = lin(h, cls_p[16], cls_p[17])            # (tile_b, 128) f32

    # ---- color-predictor branch ---------------------------------------------
    g = x1_ref[...].astype(jnp.bfloat16)
    # img->256, 256->128, 128->64 (each + ReLU), all unpadded
    for i in range(3):
        g = relu(lin(g, col_p[2 * i], col_p[2 * i + 1]))
    # 64 -> NUM_COLORS; weight/bias placed at lanes 64:67, rest zero.
    colors_pad = lin(g, col_p[6], col_p[7])              # (tile_b, 128) f32

    # Padded lanes of both tails are exactly zero (zero weight cols + zero bias
    # lanes, and both activations map 0 -> 0), so a single add merges the two
    # branch results into one lane-dense slab: lanes 0:3 = logits, 64:67 = colors.
    out_ref[...] = logits_pad + colors_pad


# ---------------------------------------------------------------------------
# Wrapper
# ---------------------------------------------------------------------------
def _round_up(n, m):
    return -(-n // m) * m


def contour_classifier_forward(x0, x1, cls_flat, col_flat, *, tile_b=256):
    batch = x0.shape[0]

    # Batch tiling: pad batch to a sublane multiple, clamp the tile, then pad
    # to a tile multiple so Pallas can pipeline input/output DMA behind compute.
    pb = _round_up(batch, 8)
    tile_b = min(tile_b, pb)
    pb = _round_up(pb, tile_b)
    if pb != batch:
        x0 = jnp.pad(x0, ((0, pb - batch), (0, 0)))
        x1 = jnp.pad(x1, ((0, pb - batch), (0, 0)))

    flat_inputs = [x0, x1] + list(cls_flat) + list(col_flat)

    in_specs = [
        pl.BlockSpec((tile_b, x0.shape[1]), lambda i: (i, 0)),
        pl.BlockSpec((tile_b, x1.shape[1]), lambda i: (i, 0)),
    ]
    # Weights/biases: grid-invariant (constant block index) -> DMA'd once and
    # kept resident in VMEM across all batch tiles.
    # TODO(synk): single-buffer these params and K-tile the first-layer weights
    # (with an f32 VMEM accumulator) if image_size grows enough to threaten the
    # v7x 64 MiB VMEM budget; at these layer sizes everything fits trivially.
    for a in flat_inputs[2:]:
        in_specs.append(pl.BlockSpec(a.shape, lambda i: (0, 0)))

    out_spec = pl.BlockSpec((tile_b, LANE), lambda i: (i, 0))

    # Advisory cost estimate computed from the real shapes.
    flops = 2 * pb * sum(int(w.shape[0]) * int(w.shape[1])
                         for w in (list(cls_flat[0::2]) + list(col_flat[0::2])))
    bytes_accessed = (sum(a.size * a.dtype.itemsize for a in flat_inputs)
                      + pb * LANE * 4)

    out = pl.pallas_call(
        _fused_kernel,
        out_shape=jax.ShapeDtypeStruct((pb, LANE), jnp.float32),
        grid_spec=pltpu.PrefetchScalarGridSpec(
            num_scalar_prefetch=0,
            grid=(pb // tile_b,),
            in_specs=in_specs,
            out_specs=out_spec,
        ),
        compiler_params=pltpu.CompilerParams(
            dimension_semantics=("parallel",)),
        cost_estimate=pl.CostEstimate(
            flops=flops, transcendentals=0, bytes_accessed=bytes_accessed),
    )(*flat_inputs)

    logits = out[:batch, :CLASSES]
    colors = out[:batch, COLOR_OFF:COLOR_OFF + NUM_COLORS]
    return logits, colors


# ---------------------------------------------------------------------------
# Parameter construction (deterministic, PyTorch-default-style uniform init)
# ---------------------------------------------------------------------------
def _init_linear(key, fan_in, fan_out):
    kw, kb = jax.random.split(key)
    bound = 1.0 / math.sqrt(fan_in)
    w = jax.random.uniform(kw, (fan_in, fan_out), jnp.float32, -bound, bound)
    b = jax.random.uniform(kb, (1, fan_out), jnp.float32, -bound, bound)
    return w, b


def make_params(key, input_size, image_size):
    cls_dims = [(input_size, 128), (128, 128), (128, 128), (128, 128),
                (128, 128 * 3), (128 * 3, 128 * 3), (128 * 3, 128),
                (128, 16), (16, CLASSES)]
    col_dims = [(image_size, 256), (256, 128), (128, 64), (64, NUM_COLORS)]
    keys = jax.random.split(key, len(cls_dims) + len(col_dims))
    cls_params = [_init_linear(k, fi, fo)
                  for k, (fi, fo) in zip(keys[:len(cls_dims)], cls_dims)]
    col_params = [_init_linear(k, fi, fo)
                  for k, (fi, fo) in zip(keys[len(cls_dims):], col_dims)]
    return cls_params, col_params


def _place_cols(a, width, offset):
    """Zero array of lane-width `width` with `a` placed starting at `offset`."""
    out = jnp.zeros(a.shape[:-1] + (width,), a.dtype)
    return out.at[..., offset:offset + a.shape[-1]].set(a)


def pack_kernel_params(cls_params, col_params):
    """Weights -> bf16 (in_features, out_features); biases stay f32 (1, out).

    Only the two final 3-wide layers are padded, and only along their OUTPUT
    (lane) dim — the contraction dims stay 16 / 64, so no dead MXU rows:
      * classifier 16->CLASSES     : placed at lanes 0:3   of a 128-wide slab
      * colors     64->NUM_COLORS  : placed at lanes 64:67 of the same slab
    Padded weight cols / bias lanes are zero and both activations map 0 -> 0,
    so padded lanes stay exactly zero (do not change this invariant when
    editing activations).
    """
    def pack(w, b, offset=None):
        if offset is not None:
            w = _place_cols(w, LANE, offset)
            b = _place_cols(b, LANE, offset)
        return w.astype(jnp.bfloat16), b      # bias stays f32

    cls_flat = []
    for i, (w, b) in enumerate(cls_params):
        w, b = pack(w, b, offset=0 if i == len(cls_params) - 1 else None)
        cls_flat += [w, b]

    col_flat = []
    for i, (w, b) in enumerate(col_params):
        w, b = pack(w, b, offset=COLOR_OFF if i == len(col_params) - 1 else None)
        col_flat += [w, b]
    return cls_flat, col_flat


# ---------------------------------------------------------------------------
# Pure-JAX reference (mirrors the kernel numerics: bf16 operands/activations,
# f32 accumulation and bias add)
# ---------------------------------------------------------------------------
def _ref_forward(x0, x1, cls_params, col_params):
    def lin(h, w, b):
        return jnp.dot(h, w.astype(jnp.bfloat16),
                       preferred_element_type=jnp.float32) + b

    def lrelu(y):
        return jnp.where(y > 0, y, LEAKY_SLOPE * y).astype(jnp.bfloat16)

    def relu(y):
        return jnp.maximum(y, 0.0).astype(jnp.bfloat16)

    h = x0.astype(jnp.bfloat16)
    for i in range(4):
        h = lrelu(lin(h, *cls_params[i]))
    h = jnp.where(h > 0, h, LEAKY_SLOPE * h)     # outer LeakyReLU
    for i in range(4, 8):
        h = lrelu(lin(h, *cls_params[i]))
    logits = lin(h, *cls_params[8])

    g = x1.astype(jnp.bfloat16)
    for i in range(3):
        g = relu(lin(g, *col_params[i]))
    colors = lin(g, *col_params[3])
    return logits, colors


if __name__ == "__main__":
    BATCH = 8
    INPUT_SIZE = 32    # classifier feature size
    IMAGE_SIZE = 64    # flattened image feature size for color predictor

    key = jax.random.PRNGKey(0)
    k_x0, k_x1, k_p = jax.random.split(key, 3)
    x0 = jax.random.normal(k_x0, (BATCH, INPUT_SIZE), jnp.float32)
    x1 = jax.random.normal(k_x1, (BATCH, IMAGE_SIZE), jnp.float32)

    cls_params, col_params = make_params(k_p, INPUT_SIZE, IMAGE_SIZE)
    cls_flat, col_flat = pack_kernel_params(cls_params, col_params)

    fwd = jax.jit(contour_classifier_forward)
    logits, colors = fwd(x0, x1, cls_flat, col_flat)
    jax.block_until_ready((logits, colors))

    ref_logits, ref_colors = _ref_forward(x0, x1, cls_params, col_params)
    assert logits.shape == (BATCH, CLASSES)
    assert colors.shape == (BATCH, NUM_COLORS)
    assert jnp.allclose(logits, ref_logits, atol=2e-2, rtol=2e-2)
    assert jnp.allclose(colors, ref_colors, atol=2e-2, rtol=2e-2)

    print("KERNEL_OK")
</pallas_src>

<mosaic_0001>
module attributes {stable_mosaic.version = 11 : i64} {
  func.func @_fused_kernel(%arg0: i32, %arg1: memref<8x32xf32, #tpu.memory_space<vmem>>, %arg2: memref<8x64xf32, #tpu.memory_space<vmem>>, %arg3: memref<32x128xbf16, #tpu.memory_space<vmem>>, %arg4: memref<1x128xf32, #tpu.memory_space<vmem>>, %arg5: memref<128x128xbf16, #tpu.memory_space<vmem>>, %arg6: memref<1x128xf32, #tpu.memory_space<vmem>>, %arg7: memref<128x128xbf16, #tpu.memory_space<vmem>>, %arg8: memref<1x128xf32, #tpu.memory_space<vmem>>, %arg9: memref<128x128xbf16, #tpu.memory_space<vmem>>, %arg10: memref<1x128xf32, #tpu.memory_space<vmem>>, %arg11: memref<128x384xbf16, #tpu.memory_space<vmem>>, %arg12: memref<1x384xf32, #tpu.memory_space<vmem>>, %arg13: memref<384x384xbf16, #tpu.memory_space<vmem>>, %arg14: memref<1x384xf32, #tpu.memory_space<vmem>>, %arg15: memref<384x128xbf16, #tpu.memory_space<vmem>>, %arg16: memref<1x128xf32, #tpu.memory_space<vmem>>, %arg17: memref<128x16xbf16, #tpu.memory_space<vmem>>, %arg18: memref<1x16xf32, #tpu.memory_space<vmem>>, %arg19: memref<16x128xbf16, #tpu.memory_space<vmem>>, %arg20: memref<1x128xf32, #tpu.memory_space<vmem>>, %arg21: memref<64x256xbf16, #tpu.memory_space<vmem>>, %arg22: memref<1x256xf32, #tpu.memory_space<vmem>>, %arg23: memref<256x128xbf16, #tpu.memory_space<vmem>>, %arg24: memref<1x128xf32, #tpu.memory_space<vmem>>, %arg25: memref<128x64xbf16, #tpu.memory_space<vmem>>, %arg26: memref<1x64xf32, #tpu.memory_space<vmem>>, %arg27: memref<64x128xbf16, #tpu.memory_space<vmem>>, %arg28: memref<1x128xf32, #tpu.memory_space<vmem>>, %arg29: memref<8x128xf32, #tpu.memory_space<vmem>>) attributes {dimension_semantics = [#tpu.dimension_semantics<parallel>], iteration_bounds = array<i64: 1>, scalar_prefetch = 0 : i64, scratch_operands = 0 : i64, tpu.core_type = #tpu.core_type<tc>, window_params = [{transform_indices = @transform_0, window_bounds = array<i64: 8, 32>}, {transform_indices = @transform_1, window_bounds = array<i64: 8, 64>}, {pipeline_mode = #tpu.pipeline_mode<synchronous>, transform_indices = @transform_2, window_bounds = array<i64: 32, 128>}, {pipeline_mode = #tpu.pipeline_mode<synchronous>, transform_indices = @transform_3, window_bounds = array<i64: 1, 128>}, {pipeline_mode = #tpu.pipeline_mode<synchronous>, transform_indices = @transform_4, window_bounds = array<i64: 128, 128>}, {pipeline_mode = #tpu.pipeline_mode<synchronous>, transform_indices = @transform_5, window_bounds = array<i64: 1, 128>}, {pipeline_mode = #tpu.pipeline_mode<synchronous>, transform_indices = @transform_6, window_bounds = array<i64: 128, 128>}, {pipeline_mode = #tpu.pipeline_mode<synchronous>, transform_indices = @transform_7, window_bounds = array<i64: 1, 128>}, {pipeline_mode = #tpu.pipeline_mode<synchronous>, transform_indices = @transform_8, window_bounds = array<i64: 128, 128>}, {pipeline_mode = #tpu.pipeline_mode<synchronous>, transform_indices = @transform_9, window_bounds = array<i64: 1, 128>}, {pipeline_mode = #tpu.pipeline_mode<synchronous>, transform_indices = @transform_10, window_bounds = array<i64: 128, 384>}, {pipeline_mode = #tpu.pipeline_mode<synchronous>, transform_indices = @transform_11, window_bounds = array<i64: 1, 384>}, {pipeline_mode = #tpu.pipeline_mode<synchronous>, transform_indices = @transform_12, window_bounds = array<i64: 384, 384>}, {pipeline_mode = #tpu.pipeline_mode<synchronous>, transform_indices = @transform_13, window_bounds = array<i64: 1, 384>}, {pipeline_mode = #tpu.pipeline_mode<synchronous>, transform_indices = @transform_14, window_bounds = array<i64: 384, 128>}, {pipeline_mode = #tpu.pipeline_mode<synchronous>, transform_indices = @transform_15, window_bounds = array<i64: 1, 128>}, {pipeline_mode = #tpu.pipeline_mode<synchronous>, transform_indices = @transform_16, window_bounds = array<i64: 128, 16>}, {pipeline_mode = #tpu.pipeline_mode<synchronous>, transform_indices = @transform_17, window_bounds = array<i64: 1, 16>}, {pipeline_mode = #tpu.pipeline_mode<synchronous>, transform_indices = @transform_18, window_bounds = array<i64: 16, 128>}, {pipeline_mode = #tpu.pipeline_mode<synchronous>, transform_indices = @transform_19, window_bounds = array<i64: 1, 128>}, {pipeline_mode = #tpu.pipeline_mode<synchronous>, transform_indices = @transform_20, window_bounds = array<i64: 64, 256>}, {pipeline_mode = #tpu.pipeline_mode<synchronous>, transform_indices = @transform_21, window_bounds = array<i64: 1, 256>}, {pipeline_mode = #tpu.pipeline_mode<synchronous>, transform_indices = @transform_22, window_bounds = array<i64: 256, 128>}, {pipeline_mode = #tpu.pipeline_mode<synchronous>, transform_indices = @transform_23, window_bounds = array<i64: 1, 128>}, {pipeline_mode = #tpu.pipeline_mode<synchronous>, transform_indices = @transform_24, window_bounds = array<i64: 128, 64>}, {pipeline_mode = #tpu.pipeline_mode<synchronous>, transform_indices = @transform_25, window_bounds = array<i64: 1, 64>}, {pipeline_mode = #tpu.pipeline_mode<synchronous>, transform_indices = @transform_26, window_bounds = array<i64: 64, 128>}, {pipeline_mode = #tpu.pipeline_mode<synchronous>, transform_indices = @transform_27, window_bounds = array<i64: 1, 128>}, {transform_indices = @transform_28, window_bounds = array<i64: 8, 128>}]} {
    %c0 = arith.constant 0 : index
    %c0_0 = arith.constant 0 : index
    %0 = vector.load %arg1[%c0, %c0_0] : memref<8x32xf32, #tpu.memory_space<vmem>>, vector<8x32xf32>
    %1 = arith.truncf %0 : vector<8x32xf32> to vector<8x32xbf16>
    %c0_1 = arith.constant 0 : index
    %c0_2 = arith.constant 0 : index
    %2 = vector.load %arg3[%c0_1, %c0_2] : memref<32x128xbf16, #tpu.memory_space<vmem>>, vector<32x128xbf16>
    %cst = arith.constant dense<0.000000e+00> : vector<8x128xf32>
    %3 = tpu.matmul %1, %2, %cst {dimension_numbers = #tpu.dot_dimension_numbers<[1], [0], [0], [1], [0, 0, 1, 1], [], []>} : vector<8x32xbf16>, vector<32x128xbf16>, vector<8x128xf32> -> vector<8x128xf32>
    %c0_3 = arith.constant 0 : index
    %c0_4 = arith.constant 0 : index
    %4 = vector.load %arg4[%c0_3, %c0_4] : memref<1x128xf32, #tpu.memory_space<vmem>>, vector<1x128xf32>
    %5 = vector.broadcast %4 : vector<1x128xf32> to vector<8x128xf32>
    %6 = arith.addf %3, %5 : vector<8x128xf32>
    %cst_5 = arith.constant 0.000000e+00 : f32
    %7 = vector.broadcast %cst_5 : f32 to vector<8x128xf32>
    %8 = arith.cmpf ogt, %6, %7 : vector<8x128xf32>
    %cst_6 = arith.constant 0.00999999977 : f32
    %9 = vector.broadcast %cst_6 : f32 to vector<8x128xf32>
    %10 = arith.mulf %9, %6 : vector<8x128xf32>
    %11 = arith.select %8, %6, %10 : vector<8x128xi1>, vector<8x128xf32>
    %12 = arith.truncf %11 : vector<8x128xf32> to vector<8x128xbf16>
    %c0_7 = arith.constant 0 : index
    %c0_8 = arith.constant 0 : index
    %13 = vector.load %arg5[%c0_7, %c0_8] : memref<128x128xbf16, #tpu.memory_space<vmem>>, vector<128x128xbf16>
    %cst_9 = arith.constant dense<0.000000e+00> : vector<8x128xf32>
    %14 = tpu.matmul %12, %13, %cst_9 {dimension_numbers = #tpu.dot_dimension_numbers<[1], [0], [0], [1], [0, 0, 1, 1], [], []>} : vector<8x128xbf16>, vector<128x128xbf16>, vector<8x128xf32> -> vector<8x128xf32>
    %c0_10 = arith.constant 0 : index
    %c0_11 = arith.constant 0 : index
    %15 = vector.load %arg6[%c0_10, %c0_11] : memref<1x128xf32, #tpu.memory_space<vmem>>, vector<1x128xf32>
    %16 = vector.broadcast %15 : vector<1x128xf32> to vector<8x128xf32>
    %17 = arith.addf %14, %16 : vector<8x128xf32>
    %cst_12 = arith.constant 0.000000e+00 : f32
    %18 = vector.broadcast %cst_12 : f32 to vector<8x128xf32>
    %19 = arith.cmpf ogt, %17, %18 : vector<8x128xf32>
    %cst_13 = arith.constant 0.00999999977 : f32
    %20 = vector.broadcast %cst_13 : f32 to vector<8x128xf32>
    %21 = arith.mulf %20, %17 : vector<8x128xf32>
    %22 = arith.select %19, %17, %21 : vector<8x128xi1>, vector<8x128xf32>
    %23 = arith.truncf %22 : vector<8x128xf32> to vector<8x128xbf16>
    %c0_14 = arith.constant 0 : index
    %c0_15 = arith.constant 0 : index
    %24 = vector.load %arg7[%c0_14, %c0_15] : memref<128x128xbf16, #tpu.memory_space<vmem>>, vector<128x128xbf16>
    %cst_16 = arith.constant dense<0.000000e+00> : vector<8x128xf32>
    %25 = tpu.matmul %23, %24, %cst_16 {dimension_numbers = #tpu.dot_dimension_numbers<[1], [0], [0], [1], [0, 0, 1, 1], [], []>} : vector<8x128xbf16>, vector<128x128xbf16>, vector<8x128xf32> -> vector<8x128xf32>
    %c0_17 = arith.constant 0 : index
    %c0_18 = arith.constant 0 : index
    %26 = vector.load %arg8[%c0_17, %c0_18] : memref<1x128xf32, #tpu.memory_space<vmem>>, vector<1x128xf32>
    %27 = vector.broadcast %26 : vector<1x128xf32> to vector<8x128xf32>
    %28 = arith.addf %25, %27 : vector<8x128xf32>
    %cst_19 = arith.constant 0.000000e+00 : f32
    %29 = vector.broadcast %cst_19 : f32 to vector<8x128xf32>
    %30 = arith.cmpf ogt, %28, %29 : vector<8x128xf32>
    %cst_20 = arith.constant 0.00999999977 : f32
    %31 = vector.broadcast %cst_20 : f32 to vector<8x128xf32>
    %32 = arith.mulf %31, %28 : vector<8x128xf32>
    %33 = arith.select %30, %28, %32 : vector<8x128xi1>, vector<8x128xf32>
    %34 = arith.truncf %33 : vector<8x128xf32> to vector<8x128xbf16>
    %c0_21 = arith.constant 0 : index
    %c0_22 = arith.constant 0 : index
    %35 = vector.load %arg9[%c0_21, %c0_22] : memref<128x128xbf16, #tpu.memory_space<vmem>>, vector<128x128xbf16>
    %cst_23 = arith.constant dense<0.000000e+00> : vector<8x128xf32>
    %36 = tpu.matmul %34, %35, %cst_23 {dimension_numbers = #tpu.dot_dimension_numbers<[1], [0], [0], [1], [0, 0, 1, 1], [], []>} : vector<8x128xbf16>, vector<128x128xbf16>, vector<8x128xf32> -> vector<8x128xf32>
    %c0_24 = arith.constant 0 : index
    %c0_25 = arith.constant 0 : index
    %37 = vector.load %arg10[%c0_24, %c0_25] : memref<1x128xf32, #tpu.memory_space<vmem>>, vector<1x128xf32>
    %38 = vector.broadcast %37 : vector<1x128xf32> to vector<8x128xf32>
    %39 = arith.addf %36, %38 : vector<8x128xf32>
    %cst_26 = arith.constant 0.000000e+00 : f32
    %40 = vector.broadcast %cst_26 : f32 to vector<8x128xf32>
    %41 = arith.cmpf ogt, %39, %40 : vector<8x128xf32>
    %cst_27 = arith.constant 0.00999999977 : f32
    %42 = vector.broadcast %cst_27 : f32 to vector<8x128xf32>
    %43 = arith.mulf %42, %39 : vector<8x128xf32>
    %44 = arith.select %41, %39, %43 : vector<8x128xi1>, vector<8x128xf32>
    %45 = arith.truncf %44 : vector<8x128xf32> to vector<8x128xbf16>
    %cst_28 = arith.constant 0.000000e+00 : bf16
    %46 = vector.broadcast %cst_28 : bf16 to vector<8x128xbf16>
    %47 = arith.cmpf ogt, %45, %46 : vector<8x128xbf16>
    %cst_29 = arith.constant 1.000980e-02 : bf16
    %48 = vector.broadcast %cst_29 : bf16 to vector<8x128xbf16>
    %49 = arith.mulf %48, %45 : vector<8x128xbf16>
    %50 = arith.select %47, %45, %49 : vector<8x128xi1>, vector<8x128xbf16>
    %c0_30 = arith.constant 0 : index
    %c0_31 = arith.constant 0 : index
    %51 = vector.load %arg11[%c0_30, %c0_31] : memref<128x384xbf16, #tpu.memory_space<vmem>>, vector<128x384xbf16>
    %cst_32 = arith.constant dense<0.000000e+00> : vector<8x384xf32>
    %52 = tpu.matmul %50, %51, %cst_32 {dimension_numbers = #tpu.dot_dimension_numbers<[1], [0], [0], [1], [0, 0, 1, 1], [], []>} : vector<8x128xbf16>, vector<128x384xbf16>, vector<8x384xf32> -> vector<8x384xf32>
    %c0_33 = arith.constant 0 : index
    %c0_34 = arith.constant 0 : index
    %53 = vector.load %arg12[%c0_33, %c0_34] : memref<1x384xf32, #tpu.memory_space<vmem>>, vector<1x384xf32>
    %54 = vector.broadcast %53 : vector<1x384xf32> to vector<8x384xf32>
    %55 = arith.addf %52, %54 : vector<8x384xf32>
    %cst_35 = arith.constant 0.000000e+00 : f32
    %56 = vector.broadcast %cst_35 : f32 to vector<8x384xf32>
    %57 = arith.cmpf ogt, %55, %56 : vector<8x384xf32>
    %cst_36 = arith.constant 0.00999999977 : f32
    %58 = vector.broadcast %cst_36 : f32 to vector<8x384xf32>
    %59 = arith.mulf %58, %55 : vector<8x384xf32>
    %60 = arith.select %57, %55, %59 : vector<8x384xi1>, vector<8x384xf32>
    %61 = arith.truncf %60 : vector<8x384xf32> to vector<8x384xbf16>
    %c0_37 = arith.constant 0 : index
    %c0_38 = arith.constant 0 : index
    %62 = vector.load %arg13[%c0_37, %c0_38] : memref<384x384xbf16, #tpu.memory_space<vmem>>, vector<384x384xbf16>
    %cst_39 = arith.constant dense<0.000000e+00> : vector<8x384xf32>
    %63 = tpu.matmul %61, %62, %cst_39 {dimension_numbers = #tpu.dot_dimension_numbers<[1], [0], [0], [1], [0, 0, 1, 1], [], []>} : vector<8x384xbf16>, vector<384x384xbf16>, vector<8x384xf32> -> vector<8x384xf32>
    %c0_40 = arith.constant 0 : index
    %c0_41 = arith.constant 0 : index
    %64 = vector.load %arg14[%c0_40, %c0_41] : memref<1x384xf32, #tpu.memory_space<vmem>>, vector<1x384xf32>
    %65 = vector.broadcast %64 : vector<1x384xf32> to vector<8x384xf32>
    %66 = arith.addf %63, %65 : vector<8x384xf32>
    %cst_42 = arith.constant 0.000000e+00 : f32
    %67 = vector.broadcast %cst_42 : f32 to vector<8x384xf32>
    %68 = arith.cmpf ogt, %66, %67 : vector<8x384xf32>
    %cst_43 = arith.constant 0.00999999977 : f32
    %69 = vector.broadcast %cst_43 : f32 to vector<8x384xf32>
    %70 = arith.mulf %69, %66 : vector<8x384xf32>
    %71 = arith.select %68, %66, %70 : vector<8x384xi1>, vector<8x384xf32>
    %72 = arith.truncf %71 : vector<8x384xf32> to vector<8x384xbf16>
    %c0_44 = arith.constant 0 : index
    %c0_45 = arith.constant 0 : index
    %73 = vector.load %arg15[%c0_44, %c0_45] : memref<384x128xbf16, #tpu.memory_space<vmem>>, vector<384x128xbf16>
    %cst_46 = arith.constant dense<0.000000e+00> : vector<8x128xf32>
    %74 = tpu.matmul %72, %73, %cst_46 {dimension_numbers = #tpu.dot_dimension_numbers<[1], [0], [0], [1], [0, 0, 1, 1], [], []>} : vector<8x384xbf16>, vector<384x128xbf16>, vector<8x128xf32> -> vector<8x128xf32>
    %c0_47 = arith.constant 0 : index
    %c0_48 = arith.constant 0 : index
    %75 = vector.load %arg16[%c0_47, %c0_48] : memref<1x128xf32, #tpu.memory_space<vmem>>, vector<1x128xf32>
    %76 = vector.broadcast %75 : vector<1x128xf32> to vector<8x128xf32>
    %77 = arith.addf %74, %76 : vector<8x128xf32>
    %cst_49 = arith.constant 0.000000e+00 : f32
    %78 = vector.broadcast %cst_49 : f32 to vector<8x128xf32>
    %79 = arith.cmpf ogt, %77, %78 : vector<8x128xf32>
    %cst_50 = arith.constant 0.00999999977 : f32
    %80 = vector.broadcast %cst_50 : f32 to vector<8x128xf32>
    %81 = arith.mulf %80, %77 : vector<8x128xf32>
    %82 = arith.select %79, %77, %81 : vector<8x128xi1>, vector<8x128xf32>
    %83 = arith.truncf %82 : vector<8x128xf32> to vector<8x128xbf16>
    %c0_51 = arith.constant 0 : index
    %c0_52 = arith.constant 0 : index
    %84 = vector.load %arg17[%c0_51, %c0_52] : memref<128x16xbf16, #tpu.memory_space<vmem>>, vector<128x16xbf16>
    %cst_53 = arith.constant dense<0.000000e+00> : vector<8x16xf32>
    %85 = tpu.matmul %83, %84, %cst_53 {dimension_numbers = #tpu.dot_dimension_numbers<[1], [0], [0], [1], [0, 0, 1, 1], [], []>} : vector<8x128xbf16>, vector<128x16xbf16>, vector<8x16xf32> -> vector<8x16xf32>
    %c0_54 = arith.constant 0 : index
    %c0_55 = arith.constant 0 : index
    %86 = vector.load %arg18[%c0_54, %c0_55] : memref<1x16xf32, #tpu.memory_space<vmem>>, vector<1x16xf32>
    %87 = vector.broadcast %86 : vector<1x16xf32> to vector<8x16xf32>
    %88 = arith.addf %85, %87 : vector<8x16xf32>
    %cst_56 = arith.constant 0.000000e+00 : f32
    %89 = vector.broadcast %cst_56 : f32 to vector<8x16xf32>
    %90 = arith.cmpf ogt, %88, %89 : vector<8x16xf32>
    %cst_57 = arith.constant 0.00999999977 : f32
    %91 = vector.broadcast %cst_57 : f32 to vector<8x16xf32>
    %92 = arith.mulf %91, %88 : vector<8x16xf32>
    %93 = arith.select %90, %88, %92 : vector<8x16xi1>, vector<8x16xf32>
    %94 = arith.truncf %93 : vector<8x16xf32> to vector<8x16xbf16>
    %c0_58 = arith.constant 0 : index
    %c0_59 = arith.constant 0 : index
    %95 = vector.load %arg19[%c0_58, %c0_59] : memref<16x128xbf16, #tpu.memory_space<vmem>>, vector<16x128xbf16>
    %cst_60 = arith.constant dense<0.000000e+00> : vector<8x128xf32>
    %96 = tpu.matmul %94, %95, %cst_60 {dimension_numbers = #tpu.dot_dimension_numbers<[1], [0], [0], [1], [0, 0, 1, 1], [], []>} : vector<8x16xbf16>, vector<16x128xbf16>, vector<8x128xf32> -> vector<8x128xf32>
    %c0_61 = arith.constant 0 : index
    %c0_62 = arith.constant 0 : index
    %97 = vector.load %arg20[%c0_61, %c0_62] : memref<1x128xf32, #tpu.memory_space<vmem>>, vector<1x128xf32>
    %98 = vector.broadcast %97 : vector<1x128xf32> to vector<8x128xf32>
    %99 = arith.addf %96, %98 : vector<8x128xf32>
    %c0_63 = arith.constant 0 : index
    %c0_64 = arith.constant 0 : index
    %100 = vector.load %arg2[%c0_63, %c0_64] : memref<8x64xf32, #tpu.memory_space<vmem>>, vector<8x64xf32>
    %101 = arith.truncf %100 : vector<8x64xf32> to vector<8x64xbf16>
    %c0_65 = arith.constant 0 : index
    %c0_66 = arith.constant 0 : index
    %102 = vector.load %arg21[%c0_65, %c0_66] : memref<64x256xbf16, #tpu.memory_space<vmem>>, vector<64x256xbf16>
    %cst_67 = arith.constant dense<0.000000e+00> : vector<8x256xf32>
    %103 = tpu.matmul %101, %102, %cst_67 {dimension_numbers = #tpu.dot_dimension_numbers<[1], [0], [0], [1], [0, 0, 1, 1], [], []>} : vector<8x64xbf16>, vector<64x256xbf16>, vector<8x256xf32> -> vector<8x256xf32>
    %c0_68 = arith.constant 0 : index
    %c0_69 = arith.constant 0 : index
    %104 = vector.load %arg22[%c0_68, %c0_69] : memref<1x256xf32, #tpu.memory_space<vmem>>, vector<1x256xf32>
    %105 = vector.broadcast %104 : vector<1x256xf32> to vector<8x256xf32>
    %106 = arith.addf %103, %105 : vector<8x256xf32>
    %cst_70 = arith.constant 0.000000e+00 : f32
    %107 = vector.broadcast %cst_70 : f32 to vector<8x256xf32>
    %108 = arith.maximumf %106, %107 : vector<8x256xf32>
    %109 = arith.truncf %108 : vector<8x256xf32> to vector<8x256xbf16>
    %c0_71 = arith.constant 0 : index
    %c0_72 = arith.constant 0 : index
    %110 = vector.load %arg23[%c0_71, %c0_72] : memref<256x128xbf16, #tpu.memory_space<vmem>>, vector<256x128xbf16>
    %cst_73 = arith.constant dense<0.000000e+00> : vector<8x128xf32>
    %111 = tpu.matmul %109, %110, %cst_73 {dimension_numbers = #tpu.dot_dimension_numbers<[1], [0], [0], [1], [0, 0, 1, 1], [], []>} : vector<8x256xbf16>, vector<256x128xbf16>, vector<8x128xf32> -> vector<8x128xf32>
    %c0_74 = arith.constant 0 : index
    %c0_75 = arith.constant 0 : index
    %112 = vector.load %arg24[%c0_74, %c0_75] : memref<1x128xf32, #tpu.memory_space<vmem>>, vector<1x128xf32>
    %113 = vector.broadcast %112 : vector<1x128xf32> to vector<8x128xf32>
    %114 = arith.addf %111, %113 : vector<8x128xf32>
    %cst_76 = arith.constant 0.000000e+00 : f32
    %115 = vector.broadcast %cst_76 : f32 to vector<8x128xf32>
    %116 = arith.maximumf %114, %115 : vector<8x128xf32>
    %117 = arith.truncf %116 : vector<8x128xf32> to vector<8x128xbf16>
    %c0_77 = arith.constant 0 : index
    %c0_78 = arith.constant 0 : index
    %118 = vector.load %arg25[%c0_77, %c0_78] : memref<128x64xbf16, #tpu.memory_space<vmem>>, vector<128x64xbf16>
    %cst_79 = arith.constant dense<0.000000e+00> : vector<8x64xf32>
    %119 = tpu.matmul %117, %118, %cst_79 {dimension_numbers = #tpu.dot_dimension_numbers<[1], [0], [0], [1], [0, 0, 1, 1], [], []>} : vector<8x128xbf16>, vector<128x64xbf16>, vector<8x64xf32> -> vector<8x64xf32>
    %c0_80 = arith.constant 0 : index
    %c0_81 = arith.constant 0 : index
    %120 = vector.load %arg26[%c0_80, %c0_81] : memref<1x64xf32, #tpu.memory_space<vmem>>, vector<1x64xf32>
    %121 = vector.broadcast %120 : vector<1x64xf32> to vector<8x64xf32>
    %122 = arith.addf %119, %121 : vector<8x64xf32>
    %cst_82 = arith.constant 0.000000e+00 : f32
    %123 = vector.broadcast %cst_82 : f32 to vector<8x64xf32>
    %124 = arith.maximumf %122, %123 : vector<8x64xf32>
    %125 = arith.truncf %124 : vector<8x64xf32> to vector<8x64xbf16>
    %c0_83 = arith.constant 0 : index
    %c0_84 = arith.constant 0 : index
    %126 = vector.load %arg27[%c0_83, %c0_84] : memref<64x128xbf16, #tpu.memory_space<vmem>>, vector<64x128xbf16>
    %cst_85 = arith.constant dense<0.000000e+00> : vector<8x128xf32>
    %127 = tpu.matmul %125, %126, %cst_85 {dimension_numbers = #tpu.dot_dimension_numbers<[1], [0], [0], [1], [0, 0, 1, 1], [], []>} : vector<8x64xbf16>, vector<64x128xbf16>, vector<8x128xf32> -> vector<8x128xf32>
    %c0_86 = arith.constant 0 : index
    %c0_87 = arith.constant 0 : index
    %128 = vector.load %arg28[%c0_86, %c0_87] : memref<1x128xf32, #tpu.memory_space<vmem>>, vector<1x128xf32>
    %129 = vector.broadcast %128 : vector<1x128xf32> to vector<8x128xf32>
    %130 = arith.addf %127, %129 : vector<8x128xf32>
    %131 = arith.addf %99, %130 : vector<8x128xf32>
    %c0_88 = arith.constant 0 : index
    %c0_89 = arith.constant 0 : index
    %132 = vector.load %arg29[%c0_88, %c0_89] : memref<8x128xf32, #tpu.memory_space<vmem>>, vector<8x128xf32>
    tpu.vector_store %arg29[%c0_88, %c0_89], %131 {strides = array<i32>} : memref<8x128xf32, #tpu.memory_space<vmem>>, vector<8x128xf32>,
    return
  }
  func.func @transform_0(%arg0: i32) -> (i32, i32) {
    %c0_i32 = arith.constant 0 : i32
    %c0_i32_0 = arith.constant 0 : i32
    return %arg0, %c0_i32 : i32, i32
  }
  func.func @transform_1(%arg0: i32) -> (i32, i32) {
    %c0_i32 = arith.constant 0 : i32
    %c0_i32_0 = arith.constant 0 : i32
    return %arg0, %c0_i32 : i32, i32
  }
  func.func @transform_2(%arg0: i32) -> (i32, i32) {
    %c0_i32 = arith.constant 0 : i32
    %c0_i32_0 = arith.constant 0 : i32
    %c0_i32_1 = arith.constant 0 : i32
    return %c0_i32, %c0_i32_0 : i32, i32
  }
  func.func @transform_3(%arg0: i32) -> (i32, i32) {
    %c0_i32 = arith.constant 0 : i32
    %c0_i32_0 = arith.constant 0 : i32
    %c0_i32_1 = arith.constant 0 : i32
    return %c0_i32, %c0_i32_0 : i32, i32
  }
  func.func @transform_4(%arg0: i32) -> (i32, i32) {
    %c0_i32 = arith.constant 0 : i32
    %c0_i32_0 = arith.constant 0 : i32
    %c0_i32_1 = arith.constant 0 : i32
    return %c0_i32, %c0_i32_0 : i32, i32
  }
  func.func @transform_5(%arg0: i32) -> (i32, i32) {
    %c0_i32 = arith.constant 0 : i32
    %c0_i32_0 = arith.constant 0 : i32
    %c0_i32_1 = arith.constant 0 : i32
    return %c0_i32, %c0_i32_0 : i32, i32
  }
  func.func @transform_6(%arg0: i32) -> (i32, i32) {
    %c0_i32 = arith.constant 0 : i32
    %c0_i32_0 = arith.constant 0 : i32
    %c0_i32_1 = arith.constant 0 : i32
    return %c0_i32, %c0_i32_0 : i32, i32
  }
  func.func @transform_7(%arg0: i32) -> (i32, i32) {
    %c0_i32 = arith.constant 0 : i32
    %c0_i32_0 = arith.constant 0 : i32
    %c0_i32_1 = arith.constant 0 : i32
    return %c0_i32, %c0_i32_0 : i32, i32
  }
  func.func @transform_8(%arg0: i32) -> (i32, i32) {
    %c0_i32 = arith.constant 0 : i32
    %c0_i32_0 = arith.constant 0 : i32
    %c0_i32_1 = arith.constant 0 : i32
    return %c0_i32, %c0_i32_0 : i32, i32
  }
  func.func @transform_9(%arg0: i32) -> (i32, i32) {
    %c0_i32 = arith.constant 0 : i32
    %c0_i32_0 = arith.constant 0 : i32
    %c0_i32_1 = arith.constant 0 : i32
    return %c0_i32, %c0_i32_0 : i32, i32
  }
  func.func @transform_10(%arg0: i32) -> (i32, i32) {
    %c0_i32 = arith.constant 0 : i32
    %c0_i32_0 = arith.constant 0 : i32
    %c0_i32_1 = arith.constant 0 : i32
    return %c0_i32, %c0_i32_0 : i32, i32
  }
  func.func @transform_11(%arg0: i32) -> (i32, i32) {
    %c0_i32 = arith.constant 0 : i32
    %c0_i32_0 = arith.constant 0 : i32
    %c0_i32_1 = arith.constant 0 : i32
    return %c0_i32, %c0_i32_0 : i32, i32
  }
  func.func @transform_12(%arg0: i32) -> (i32, i32) {
    %c0_i32 = arith.constant 0 : i32
    %c0_i32_0 = arith.constant 0 : i32
    %c0_i32_1 = arith.constant 0 : i32
    return %c0_i32, %c0_i32_0 : i32, i32
  }
  func.func @transform_13(%arg0: i32) -> (i32, i32) {
    %c0_i32 = arith.constant 0 : i32
    %c0_i32_0 = arith.constant 0 : i32
    %c0_i32_1 = arith.constant 0 : i32
    return %c0_i32, %c0_i32_0 : i32, i32
  }
  func.func @transform_14(%arg0: i32) -> (i32, i32) {
    %c0_i32 = arith.constant 0 : i32
    %c0_i32_0 = arith.constant 0 : i32
    %c0_i32_1 = arith.constant 0 : i32
    return %c0_i32, %c0_i32_0 : i32, i32
  }
  func.func @transform_15(%arg0: i32) -> (i32, i32) {
    %c0_i32 = arith.constant 0 : i32
    %c0_i32_0 = arith.constant 0 : i32
    %c0_i32_1 = arith.constant 0 : i32
    return %c0_i32, %c0_i32_0 : i32, i32
  }
  func.func @transform_16(%arg0: i32) -> (i32, i32) {
    %c0_i32 = arith.constant 0 : i32
    %c0_i32_0 = arith.constant 0 : i32
    %c0_i32_1 = arith.constant 0 : i32
    return %c0_i32, %c0_i32_0 : i32, i32
  }
  func.func @transform_17(%arg0: i32) -> (i32, i32) {
    %c0_i32 = arith.constant 0 : i32
    %c0_i32_0 = arith.constant 0 : i32
    %c0_i32_1 = arith.constant 0 : i32
    return %c0_i32, %c0_i32_0 : i32, i32
  }
  func.func @transform_18(%arg0: i32) -> (i32, i32) {
    %c0_i32 = arith.constant 0 : i32
    %c0_i32_0 = arith.constant 0 : i32
    %c0_i32_1 = arith.constant 0 : i32
    return %c0_i32, %c0_i32_0 : i32, i32
  }
  func.func @transform_19(%arg0: i32) -> (i32, i32) {
    %c0_i32 = arith.constant 0 : i32
    %c0_i32_0 = arith.constant 0 : i32
    %c0_i32_1 = arith.constant 0 : i32
    return %c0_i32, %c0_i32_0 : i32, i32
  }
  func.func @transform_20(%arg0: i32) -> (i32, i32) {
    %c0_i32 = arith.constant 0 : i32
    %c0_i32_0 = arith.constant 0 : i32
    %c0_i32_1 = arith.constant 0 : i32
    return %c0_i32, %c0_i32_0 : i32, i32
  }
  func.func @transform_21(%arg0: i32) -> (i32, i32) {
    %c0_i32 = arith.constant 0 : i32
    %c0_i32_0 = arith.constant 0 : i32
    %c0_i32_1 = arith.constant 0 : i32
    return %c0_i32, %c0_i32_0 : i32, i32
  }
  func.func @transform_22(%arg0: i32) -> (i32, i32) {
    %c0_i32 = arith.constant 0 : i32
    %c0_i32_0 = arith.constant 0 : i32
    %c0_i32_1 = arith.constant 0 : i32
    return %c0_i32, %c0_i32_0 : i32, i32
  }
  func.func @transform_23(%arg0: i32) -> (i32, i32) {
    %c0_i32 = arith.constant 0 : i32
    %c0_i32_0 = arith.constant 0 : i32
    %c0_i32_1 = arith.constant 0 : i32
    return %c0_i32, %c0_i32_0 : i32, i32
  }
  func.func @transform_24(%arg0: i32) -> (i32, i32) {
    %c0_i32 = arith.constant 0 : i32
    %c0_i32_0 = arith.constant 0 : i32
    %c0_i32_1 = arith.constant 0 : i32
    return %c0_i32, %c0_i32_0 : i32, i32
  }
  func.func @transform_25(%arg0: i32) -> (i32, i32) {
    %c0_i32 = arith.constant 0 : i32
    %c0_i32_0 = arith.constant 0 : i32
    %c0_i32_1 = arith.constant 0 : i32
    return %c0_i32, %c0_i32_0 : i32, i32
  }
  func.func @transform_26(%arg0: i32) -> (i32, i32) {
    %c0_i32 = arith.constant 0 : i32
    %c0_i32_0 = arith.constant 0 : i32
    %c0_i32_1 = arith.constant 0 : i32
    return %c0_i32, %c0_i32_0 : i32, i32
  }
  func.func @transform_27(%arg0: i32) -> (i32, i32) {
    %c0_i32 = arith.constant 0 : i32
    %c0_i32_0 = arith.constant 0 : i32
    %c0_i32_1 = arith.constant 0 : i32
    return %c0_i32, %c0_i32_0 : i32, i32
  }
  func.func @transform_28(%arg0: i32) -> (i32, i32) {
    %c0_i32 = arith.constant 0 : i32
    %c0_i32_0 = arith.constant 0 : i32
    return %arg0, %c0_i32 : i32, i32
  }
}

</mosaic_0001>

<bundles_post_ra>
// kernel: contour_classifier_forward.1
= control target key start
LH: loop header
LB: loop body
LE: loop exit
PB: predicated region body
PF: predicated region fallthrough
CT: control target
= control target key end

     0   :  { %s4717_s0 = inlined_call_operand.hbm [shape: f32[8,32], index: 0, kind: input, shape index: {}]   ;;  %s4718_s1 = inlined_call_operand.hbm [shape: f32[8,64], index: 1, kind: input, shape index: {}]   ;;  %s4719_s2 = inlined_call_operand.hbm [shape: bf16[32,128], index: 2, kind: input, shape index: {}]   ;;  %s4720_s3 = inlined_call_operand.hbm [shape: f32[1,128], index: 3, kind: input, shape index: {}]   ;;  %s4721_s4 = inlined_call_operand.hbm [shape: bf16[128,128], index: 4, kind: input, shape index: {}]   ;;  %s4722_s5 = inlined_call_operand.hbm [shape: f32[1,128], index: 5, kind: input, shape index: {}]   ;;  %s4723_s6 = inlined_call_operand.hbm [shape: bf16[128,128], index: 6, kind: input, shape index: {}]   ;;  %s4724_s7 = inlined_call_operand.hbm [shape: f32[1,128], index: 7, kind: input, shape index: {}]   ;;  %s4725_s8 = inlined_call_operand.hbm [shape: bf16[128,128], index: 8, kind: input, shape index: {}]   ;;  %s4726_s9 = inlined_call_operand.hbm [shape: f32[1,128], index: 9, kind: input, shape index: {}]   ;;  %s4727_s10 = inlined_call_operand.vmem [shape: bf16[128,384], index: 10, kind: input, shape index: {}]   ;;  %s4728_s11 = inlined_call_operand.hbm [shape: f32[1,384], index: 11, kind: input, shape index: {}]   ;;  %s4729_s12 = inlined_call_operand.hbm [shape: bf16[384,384], index: 12, kind: input, shape index: {}]   ;;  %s4730_s13 = inlined_call_operand.hbm [shape: f32[1,384], index: 13, kind: input, shape index: {}]   ;;  %s4731_s14 = inlined_call_operand.hbm [shape: bf16[384,128], index: 14, kind: input, shape index: {}]   ;;  %s4732_s15 = inlined_call_operand.hbm [shape: f32[1,128], index: 15, kind: input, shape index: {}]   ;;  %s4733_s16 = inlined_call_operand.vmem [shape: bf16[128,16], index: 16, kind: input, shape index: {}]   ;;  %s4734_s17 = inlined_call_operand.hbm [shape: f32[1,16], index: 17, kind: input, shape index: {}]   ;;  %s4735_s18 = inlined_call_operand.hbm [shape: bf16[16,128], index: 18, kind: input, shape index: {}]   ;;  %s4736_s19 = inlined_call_operand.hbm [shape: f32[1,128], index: 19, kind: input, shape index: {}]   ;;  %s4737_s20 = inlined_call_operand.hbm [shape: bf16[64,256], index: 20, kind: input, shape index: {}]   ;;  %s4738_s21 = inlined_call_operand.vmem [shape: f32[1,256], index: 21, kind: input, shape index: {}]   ;;  %s4739_s22 = inlined_call_operand.hbm [shape: bf16[256,128], index: 22, kind: input, shape index: {}]   ;;  %s4740_s23 = inlined_call_operand.hbm [shape: f32[1,128], index: 23, kind: input, shape index: {}]   ;;  %s4741_s24 = inlined_call_operand.vmem [shape: bf16[128,64], index: 24, kind: input, shape index: {}]   ;;  %s4742_s25 = inlined_call_operand.vmem [shape: f32[1,64], index: 25, kind: input, shape index: {}]   ;;  %s4743_s26 = inlined_call_operand.vmem [shape: bf16[64,128], index: 26, kind: input, shape index: {}]   ;;  %s4744_s27 = inlined_call_operand.vmem [shape: f32[1,128], index: 27, kind: input, shape index: {}]   ;;  %s4745_s28 = inlined_call_operand.vmem [shape: f32[8,128], index: 28, kind: output, shape index: {}]  }
   0x1   :  { %4759 = sst [smem:[#allocation45_spill]] %s4717_s0 }
   0x2   :  { %4760 = sst [smem:[#allocation46_spill]] %s4718_s1 }
   0x3   :  { %4761 = sst [smem:[#allocation47_spill]] %s4719_s2 }
   0x4   :  { %4762 = sst [smem:[#allocation48_spill]] %s4720_s3 }
   0x5   :  { %4763 = sst [smem:[#allocation49_spill]] %s4721_s4 }
   0x6   :  { %4764 = sst [smem:[#allocation50_spill]] %s4722_s5 }
   0x7   :  { %4765 = sst [smem:[#allocation51_spill]] %s4723_s6 }
   0x8   :  { %4766 = sst [smem:[#allocation52_spill]] %s4724_s7 }
   0x9   :  { %4767 = sst [smem:[#allocation53_spill]] %s4725_s8 }
   0xa   :  { %4768 = sst [smem:[#allocation54_spill]] %s4726_s9 }
   0xb   :  { %4769 = sst [smem:[#allocation55_spill]] %s4727_s10 }
   0xc   :  { %4770 = sst [smem:[#allocation56_spill]] %s4728_s11 }
   0xd   :  { %4771 = sst [smem:[#allocation57_spill]] %s4729_s12 }
   0xe   :  { %4772 = sst [smem:[#allocation58_spill]] %s4744_s27 }
   0xf   :  { %4773 = sst [smem:[#allocation59_spill]] %s4745_s28 }
  0x10   :  { %33 = vsyncpa [#allocation3], 0 }
  0x11   :  { %34 = vsyncpa [#allocation5], 0 }
  0x12   :  { %35 = vsyncpa [#allocation8], 0 }
  0x13   :  { %36 = vsyncpa [#allocation11], 0 }
  0x14   :  { %37 = vsyncpa [#allocation14], 0 }
  0x15   :  { %38 = vsyncpa [#allocation17], 0 }
  0x16   :  { %39 = vsyncpa [#allocation20], 0 }
  0x17   :  { %40 = vsyncpa [#allocation23], 0 }
  0x18   :  { %41 = vsyncpa [#allocation26], 0 }
  0x19   :  { %42 = vsyncpa [#allocation29], 0 }
  0x1a   :  { %43 = vsyncpa [#allocation32], 0  ;;  %s3962_s8 = smov [#allocation4]   ;;  %s3963_s9 = smov [#allocation7]  }
  0x1b   :  { %s60_s5 = sshll.u32 %s3962_s8, 4  ;;  %s82_s30 = sshll.u32 %s3963_s9, 4  ;;  %s61_s5 = int_to_ptr.vmem [resolvable:$true] %s60_s5  ;;  %s83_s30 = int_to_ptr.vmem [resolvable:$true] %s82_s30 }
  0x1c   :  { %s4774_s10 = sld [smem:[#allocation46_spill]] }
  0x22   :  { %s3478_s0 = scalar_lea.hbm %s4774_s10, 128 }
  0x23   :  { %p3479_p0 = scmp.ne.s32.totalorder %s4774_s10, %s3478_s0  ;;  %p3482_p1 = scmp.lt.u32.totalorder %s3478_s0, %s4774_s10 }
  0x25   :  { %p3484_p2 = pnand %p3482_p1, %p3479_p0 }
  0x27   :  { %3487 = shalt.err (!%p3484_p2)
}
  0x28   :  { %s3488_s12 = scalar_lea.vmem %s61_s5, 128  ;;  %p3493_p4 = scmp.lt.s32.totalorder %s61_s5, %s61_s5 }
  0x29   :  { %p3489_p3 = scmp.ne.s32.totalorder %s61_s5, %s3488_s12  ;;  %p3494_p5 = scmp.lt.s32.totalorder %s3488_s12, %s3488_s12 }
  0x2b   :  { %p3495_p6 = por %p3494_p5, %p3493_p4 }
  0x2d   :  { %p3496_p7 = pnand %p3495_p6, %p3489_p3 }
  0x2f   :  { %3499 = shalt.err (!%p3496_p7)
}
  0x30   :  { %63 = dma.hbm_to_vmem [thread:$0]  %s4774_s10, 128, %s61_s5, [#allocation5]  }
  0x31   :  { %s4775_s3 = sld [smem:[#allocation48_spill]] }
  0x37   :  { %s3500_s6 = scalar_lea.hbm %s4775_s3, 16 }
  0x38   :  { %p3501_p8 = scmp.ne.s32.totalorder %s4775_s3, %s3500_s6  ;;  %p3504_p9 = scmp.lt.u32.totalorder %s3500_s6, %s4775_s3 }
  0x3a   :  { %p3506_p10 = pnand %p3504_p9, %p3501_p8 }
  0x3c   :  { %3509 = shalt.err (!%p3506_p10)
}
  0x3d   :  { %s3510_s7 = scalar_lea.vmem %s83_s30, 16  ;;  %s3514_s12 = scalar_lea.vmem %s83_s30, 32 }
  0x3e   :  { %p3511_p11 = scmp.ne.s32.totalorder %s83_s30, %s3510_s7  ;;  %p3515_p12 = scmp.lt.s32.totalorder %s83_s30, %s83_s30 }
  0x3f   :  { %p3516_p13 = scmp.lt.s32.totalorder %s3514_s12, %s3510_s7 }
  0x41   :  { %p3517_p0 = por %p3516_p13, %p3515_p12 }
  0x43   :  { %p3518_p1 = pnand %p3517_p0, %p3511_p11 }
  0x45   :  { %3521 = shalt.err (!%p3518_p1)
}
  0x46   :  { %85 = dma.hbm_to_vmem [thread:$0]  %s4775_s3, 16, %s83_s30, [#allocation8]  }
  0x47   :  { %s3964_s1 = smov [#allocation10]   ;;  %s3965_s8 = smov [#allocation13]  }
  0x48   :  { %s104_s4 = sshll.u32 %s3964_s1, 4  ;;  %s126_s9 = sshll.u32 %s3965_s8, 4  ;;  %s105_s4 = int_to_ptr.vmem [resolvable:$true] %s104_s4  ;;  %s127_s9 = int_to_ptr.vmem [resolvable:$true] %s126_s9 }
  0x49   :  { %s4776_s29 = sld [smem:[#allocation50_spill]] }
  0x4f   :  { %s3522_s0 = scalar_lea.hbm %s4776_s29, 16 }
  0x50   :  { %p3523_p2 = scmp.ne.s32.totalorder %s4776_s29, %s3522_s0  ;;  %p3526_p3 = scmp.lt.u32.totalorder %s3522_s0, %s4776_s29 }
  0x52   :  { %p3528_p4 = pnand %p3526_p3, %p3523_p2 }
  0x54   :  { %3531 = shalt.err (!%p3528_p4)
}
  0x55   :  { %s3532_s30 = scalar_lea.vmem %s105_s4, 16  ;;  %s3536_s3 = scalar_lea.vmem %s105_s4, 32 }
  0x56   :  { %p3533_p5 = scmp.ne.s32.totalorder %s105_s4, %s3532_s30  ;;  %p3537_p6 = scmp.lt.s32.totalorder %s105_s4, %s105_s4 }
  0x57   :  { %p3538_p7 = scmp.lt.s32.totalorder %s3536_s3, %s3532_s30 }
  0x59   :  { %p3539_p8 = por %p3538_p7, %p3537_p6 }
  0x5b   :  { %p3540_p9 = pnand %p3539_p8, %p3533_p5 }
  0x5d   :  { %3543 = shalt.err (!%p3540_p9)
}
  0x5e   :  { %107 = dma.hbm_to_vmem [thread:$0]  %s4776_s29, 16, %s105_s4, [#allocation11]  }
  0x5f   :  { %s4777_s8 = sld [smem:[#allocation52_spill]] }
  0x65   :  { %s3544_s6 = scalar_lea.hbm %s4777_s8, 16 }
  0x66   :  { %p3545_p10 = scmp.ne.s32.totalorder %s4777_s8, %s3544_s6  ;;  %p3548_p11 = scmp.lt.u32.totalorder %s3544_s6, %s4777_s8 }
  0x68   :  { %p3550_p12 = pnand %p3548_p11, %p3545_p10 }
  0x6a   :  { %3553 = shalt.err (!%p3550_p12)
}
  0x6b   :  { %s3554_s12 = scalar_lea.vmem %s127_s9, 16  ;;  %s3558_s30 = scalar_lea.vmem %s127_s9, 32 }
  0x6c   :  { %p3555_p13 = scmp.ne.s32.totalorder %s127_s9, %s3554_s12  ;;  %p3559_p0 = scmp.lt.s32.totalorder %s127_s9, %s127_s9 }
  0x6d   :  { %p3560_p1 = scmp.lt.s32.totalorder %s3558_s30, %s3554_s12 }
  0x6f   :  { %p3561_p2 = por %p3560_p1, %p3559_p0 }
  0x71   :  { %p3562_p3 = pnand %p3561_p2, %p3555_p13 }
  0x73   :  { %3565 = shalt.err (!%p3562_p3)
}
  0x74   :  { %129 = dma.hbm_to_vmem [thread:$0]  %s4777_s8, 16, %s127_s9, [#allocation14]  }
  0x75   :  { %s3966_s3 = smov [#allocation16]   ;;  %s3967_s10 = smov [#allocation19]  }
  0x76   :  { %s148_s5 = sshll.u32 %s3966_s3, 4  ;;  %s169_s28 = sshll.u32 %s3967_s10, 4  ;;  %s149_s5 = int_to_ptr.vmem [resolvable:$true] %s148_s5  ;;  %s4185_s28 = int_to_ptr.vmem [resolvable:$true] %s169_s28 }
  0x77   :  { %s4778_s11 = sld [smem:[#allocation54_spill]] }
  0x7d   :  { %s3566_s0 = scalar_lea.hbm %s4778_s11, 16 }
  0x7e   :  { %p3567_p4 = scmp.ne.s32.totalorder %s4778_s11, %s3566_s0  ;;  %p3570_p5 = scmp.lt.u32.totalorder %s3566_s0, %s4778_s11 }
  0x80   :  { %p3572_p6 = pnand %p3570_p5, %p3567_p4 }
  0x82   :  { %3575 = shalt.err (!%p3572_p6)
}
  0x83   :  { %s3576_s9 = scalar_lea.vmem %s149_s5, 16  ;;  %s3580_s8 = scalar_lea.vmem %s149_s5, 32 }
  0x84   :  { %p3577_p7 = scmp.ne.s32.totalorder %s149_s5, %s3576_s9  ;;  %p3581_p8 = scmp.lt.s32.totalorder %s149_s5, %s149_s5 }
  0x85   :  { %p3582_p9 = scmp.lt.s32.totalorder %s3580_s8, %s3576_s9 }
  0x87   :  { %p3583_p10 = por %p3582_p9, %p3581_p8 }
  0x89   :  { %p3584_p11 = pnand %p3583_p10, %p3577_p7 }
  0x8b   :  { %3587 = shalt.err (!%p3584_p11)
}
  0x8c   :  { %151 = dma.hbm_to_vmem [thread:$0]  %s4778_s11, 16, %s149_s5, [#allocation17]  }
  0x8d   :  { %s4779_s1 = sld [smem:[#allocation57_spill]] }
  0x93   :  { %s3588_s6 = scalar_lea.hbm %s4779_s1, 9216 }
  0x94   :  { %p3589_p12 = scmp.ne.s32.totalorder %s4779_s1, %s3588_s6  ;;  %p3592_p13 = scmp.lt.u32.totalorder %s3588_s6, %s4779_s1 }
  0x96   :  { %p3594_p0 = pnand %p3592_p13, %p3589_p12 }
  0x98   :  { %3597 = shalt.err (!%p3594_p0)
}
  0x99   :  { %s3598_s30 = scalar_lea.vmem %s4185_s28, 9216  ;;  %p3603_p2 = scmp.lt.s32.totalorder %s4185_s28, %s4185_s28 }
  0x9a   :  { %p3599_p1 = scmp.ne.s32.totalorder %s4185_s28, %s3598_s30  ;;  %p3604_p3 = scmp.lt.s32.totalorder %s3598_s30, %s3598_s30 }
  0x9c   :  { %p3605_p4 = por %p3604_p3, %p3603_p2 }
  0x9e   :  { %p3606_p5 = pnand %p3605_p4, %p3599_p1 }
  0xa0   :  { %3609 = shalt.err (!%p3606_p5)
}
  0xa1   :  { %s3968_s5 = smov 192   ;;  %s3969_s11 = smov 12  }
  0xa2   :  { %175 = dma.hbm_to_vmem [thread:$0]  %s4779_s1, 9216, %s4185_s28, [#allocation20], %s3968_s5, %s3968_s5, %s3969_s11  }
  0xa3   :  { %s3970_s4 = smov [#allocation22]   ;;  %s3971_s3 = smov [#allocation25]  }
  0xa4   :  { %s191_s29 = sshll.u32 %s3970_s4, 4  ;;  %s216_s10 = sshll.u32 %s3971_s3, 4  ;;  %s192_s29 = int_to_ptr.vmem [resolvable:$true] %s191_s29  ;;  %s4216_s10 = int_to_ptr.vmem [resolvable:$true] %s216_s10 }
  0xa5   :  { %s3610_s0 = scalar_lea.hbm %s4731_s14, 3072 }
  0xa6   :  { %p3611_p6 = scmp.ne.s32.totalorder %s4731_s14, %s3610_s0  ;;  %p3614_p7 = scmp.lt.u32.totalorder %s3610_s0, %s4731_s14 }
  0xa8   :  { %p3616_p8 = pnand %p3614_p7, %p3611_p6 }
  0xaa   :  { %3619 = shalt.err (!%p3616_p8)
}
  0xab   :  { %s3620_s28 = scalar_lea.vmem %s192_s29, 3072  ;;  %p3625_p10 = scmp.lt.s32.totalorder %s192_s29, %s192_s29 }
  0xac   :  { %p3621_p9 = scmp.ne.s32.totalorder %s192_s29, %s3620_s28  ;;  %p3626_p11 = scmp.lt.s32.totalorder %s3620_s28, %s3620_s28 }
  0xae   :  { %p3627_p12 = por %p3626_p11, %p3625_p10 }
  0xb0   :  { %p3628_p13 = pnand %p3627_p12, %p3621_p9 }
  0xb2   :  { %3631 = shalt.err (!%p3628_p13)
}
  0xb3   :  { %s3972_s1 = smov 64   ;;  %s3973_s5 = smov 4  }
  0xb4   :  { %197 = dma.hbm_to_vmem [thread:$0]  %s4731_s14, 3072, %s192_s29, [#allocation23], %s3972_s1, %s3972_s1, %s3973_s5  }
  0xb5   :  { %s3632_s4 = scalar_lea.hbm %s4734_s17, 16 }
  0xb6   :  { %p3633_p0 = scmp.ne.s32.totalorder %s4734_s17, %s3632_s4  ;;  %p3636_p1 = scmp.lt.u32.totalorder %s3632_s4, %s4734_s17 }
  0xb8   :  { %p3638_p2 = pnand %p3636_p1, %p3633_p0 }
  0xba   :  { %3641 = shalt.err (!%p3638_p2)
}
  0xbb   :  { %s3642_s7 = scalar_lea.vmem %s4216_s10, 16  ;;  %s3646_s14 = scalar_lea.vmem %s4216_s10, 32 }
  0xbc   :  { %p3643_p3 = scmp.ne.s32.totalorder %s4216_s10, %s3642_s7  ;;  %p3647_p4 = scmp.lt.s32.totalorder %s4216_s10, %s4216_s10 }
  0xbd   :  { %p3648_p5 = scmp.lt.s32.totalorder %s3646_s14, %s3642_s7 }
  0xbf   :  { %p3649_p6 = por %p3648_p5, %p3647_p4 }
  0xc1   :  { %p3650_p7 = pnand %p3649_p6, %p3643_p3 }
  0xc3   :  { %3653 = shalt.err (!%p3650_p7)
}
  0xc4   :  { %219 = dma.hbm_to_vmem [thread:$0]  %s4734_s17, 16, %s4216_s10, [#allocation26]  }
  0xc5   :  { %s3974_s30 = smov [#allocation28]   ;;  %s3975_s11 = smov [#allocation31]  }
  0xc6   :  { %s238_s28 = sshll.u32 %s3974_s30, 4  ;;  %s261_s9 = sshll.u32 %s3975_s11, 4  ;;  %s239_s28 = int_to_ptr.vmem [resolvable:$true] %s238_s28  ;;  %s4251_s9 = int_to_ptr.vmem [resolvable:$true] %s261_s9 }
  0xc7   :  { %s3654_s4 = scalar_lea.hbm %s4736_s19, 16 }
  0xc8   :  { %p3655_p8 = scmp.ne.s32.totalorder %s4736_s19, %s3654_s4  ;;  %p3658_p9 = scmp.lt.u32.totalorder %s3654_s4, %s4736_s19 }
  0xca   :  { %p3660_p10 = pnand %p3658_p9, %p3655_p8 }
  0xcc   :  { %3663 = shalt.err (!%p3660_p10)
}
  0xcd   :  { %s3664_s17 = scalar_lea.vmem %s239_s28, 16  ;;  %s3668_s10 = scalar_lea.vmem %s239_s28, 32 }
  0xce   :  { %p3665_p11 = scmp.ne.s32.totalorder %s239_s28, %s3664_s17  ;;  %p3669_p12 = scmp.lt.s32.totalorder %s239_s28, %s239_s28 }
  0xcf   :  { %p3670_p13 = scmp.lt.s32.totalorder %s3668_s10, %s3664_s17 }
  0xd1   :  { %p3671_p0 = por %p3670_p13, %p3669_p12 }
  0xd3   :  { %p3672_p1 = pnand %p3671_p0, %p3665_p11 }
  0xd5   :  { %3675 = shalt.err (!%p3672_p1)
}
  0xd6   :  { %241 = dma.hbm_to_vmem [thread:$0]  %s4736_s19, 16, %s239_s28, [#allocation29]  }
  0xd7   :  { %s3676_s30 = scalar_lea.hbm %s4739_s22, 2048 }
  0xd8   :  { %p3677_p2 = scmp.ne.s32.totalorder %s4739_s22, %s3676_s30  ;;  %p3680_p3 = scmp.lt.u32.totalorder %s3676_s30, %s4739_s22 }
  0xda   :  { %p3682_p4 = pnand %p3680_p3, %p3677_p2 }
  0xdc   :  { %3685 = shalt.err (!%p3682_p4)
}
  0xdd   :  { %s3686_s3 = scalar_lea.vmem %s4251_s9, 2048  ;;  %p3691_p6 = scmp.lt.s32.totalorder %s4251_s9, %s4251_s9 }
  0xde   :  { %p3687_p5 = scmp.ne.s32.totalorder %s4251_s9, %s3686_s3  ;;  %p3692_p7 = scmp.lt.s32.totalorder %s3686_s3, %s3686_s3 }
  0xe0   :  { %p3693_p8 = por %p3692_p7, %p3691_p6 }
  0xe2   :  { %p3694_p9 = pnand %p3693_p8, %p3687_p5 }
  0xe4   :  { %3697 = shalt.err (!%p3694_p9)
}
  0xe5   :  { %267 = dma.hbm_to_vmem [thread:$0]  %s4739_s22, 2048, %s4251_s9, [#allocation32], %s3972_s1, %s3972_s1, %s3973_s5  }
  0xe6   :  { %s3976_s6 = smov [#allocation2]   ;;  %s3977_s0 = smov [#allocation6]  }
  0xe7   :  { %s50_s2 = sshll.u32 %s3976_s6, 4  ;;  %s69_s17 = sshll.u32 %s3977_s0, 4  ;;  %s51_s2 = int_to_ptr.vmem [resolvable:$true] %s50_s2  ;;  %s4285_s17 = int_to_ptr.vmem [resolvable:$true] %s69_s17 }
  0xe8   :  { %s4780_s14 = sld [smem:[#allocation45_spill]] }
  0xee   :  { %s3698_s29 = scalar_lea.hbm %s4780_s14, 128 }
  0xef   :  { %p3699_p10 = scmp.ne.s32.totalorder %s4780_s14, %s3698_s29  ;;  %p3702_p11 = scmp.lt.u32.totalorder %s3698_s29, %s4780_s14 }
  0xf1   :  { %p3704_p12 = pnand %p3702_p11, %p3699_p10 }
  0xf3   :  { %3707 = shalt.err (!%p3704_p12)
}
  0xf4   :  { %s3708_s22 = scalar_lea.vmem %s51_s2, 128  ;;  %p3713_p0 = scmp.lt.s32.totalorder %s51_s2, %s51_s2 }
  0xf5   :  { %p3709_p13 = scmp.ne.s32.totalorder %s51_s2, %s3708_s22  ;;  %p3714_p1 = scmp.lt.s32.totalorder %s3708_s22, %s3708_s22 }
  0xf7   :  { %p3715_p2 = por %p3714_p1, %p3713_p0 }
  0xf9   :  { %p3716_p3 = pnand %p3715_p2, %p3709_p13 }
  0xfb   :  { %3719 = shalt.err (!%p3716_p3)
}
  0xfc   :  { %53 = dma.hbm_to_vmem [thread:$0]  %s4780_s14, 128, %s51_s2, [#allocation3]  }
  0xfd   :  { %s4781_s19 = sld [smem:[#allocation47_spill]] }
 0x103   :  { %s3720_s28 = scalar_lea.hbm %s4781_s19, 256 }
 0x104   :  { %p3721_p4 = scmp.ne.s32.totalorder %s4781_s19, %s3720_s28  ;;  %p3724_p5 = scmp.lt.u32.totalorder %s3720_s28, %s4781_s19 }
 0x106   :  { %p3726_p6 = pnand %p3724_p5, %p3721_p4 }
 0x108   :  { %3729 = shalt.err (!%p3726_p6)
}
 0x109   :  { %s3730_s29 = scalar_lea.vmem %s4285_s17, 256  ;;  %p3735_p8 = scmp.lt.s32.totalorder %s4285_s17, %s4285_s17 }
 0x10a   :  { %p3731_p7 = scmp.ne.s32.totalorder %s4285_s17, %s3730_s29  ;;  %p3736_p9 = scmp.lt.s32.totalorder %s3730_s29, %s3730_s29 }
 0x10c   :  { %p3737_p10 = por %p3736_p9, %p3735_p8 }
 0x10e   :  { %p3738_p11 = pnand %p3737_p10, %p3731_p7 }
 0x110   :  { %3741 = shalt.err (!%p3738_p11)
}
 0x111   :  { %75 = dma.hbm_to_vmem [thread:$0]  %s4781_s19, 256, %s4285_s17, [#allocation5], %s3972_s1, %s3972_s1, %s3973_s5  }
 0x112   :  { %s3978_s12 = smov [#allocation9]   ;;  %s3979_s11 = smov [#allocation12]  }
 0x113   :  { %s91_s30 = sshll.u32 %s3978_s12, 4  ;;  %s113_s27 = sshll.u32 %s3979_s11, 4  ;;  %s92_s30 = int_to_ptr.vmem [resolvable:$true] %s91_s30  ;;  %s4319_s27 = int_to_ptr.vmem [resolvable:$true] %s113_s27 }
 0x114   :  { %s4782_s8 = sld [smem:[#allocation49_spill]] }
 0x11a   :  { %s3742_s4 = scalar_lea.hbm %s4782_s8, 1024 }
 0x11b   :  { %p3743_p12 = scmp.ne.s32.totalorder %s4782_s8, %s3742_s4  ;;  %p3746_p13 = scmp.lt.u32.totalorder %s3742_s4, %s4782_s8 }
 0x11d   :  { %p3748_p0 = pnand %p3746_p13, %p3743_p12 }
 0x11f   :  { %3751 = shalt.err (!%p3748_p0)
}
 0x120   :  { %s3752_s17 = scalar_lea.vmem %s92_s30, 1024  ;;  %p3757_p2 = scmp.lt.s32.totalorder %s92_s30, %s92_s30 }
 0x121   :  { %p3753_p1 = scmp.ne.s32.totalorder %s92_s30, %s3752_s17  ;;  %p3758_p3 = scmp.lt.s32.totalorder %s3752_s17, %s3752_s17 }
 0x123   :  { %p3759_p4 = por %p3758_p3, %p3757_p2 }
 0x125   :  { %p3760_p5 = pnand %p3759_p4, %p3753_p1 }
 0x127   :  { %3763 = shalt.err (!%p3760_p5)
}
 0x128   :  { %97 = dma.hbm_to_vmem [thread:$0]  %s4782_s8, 1024, %s92_s30, [#allocation8], %s3972_s1, %s3972_s1, %s3973_s5  }
 0x129   :  { %s4783_s2 = sld [smem:[#allocation51_spill]] }
 0x12f   :  { %s3764_s14 = scalar_lea.hbm %s4783_s2, 1024 }
 0x130   :  { %p3765_p6 = scmp.ne.s32.totalorder %s4783_s2, %s3764_s14  ;;  %p3768_p7 = scmp.lt.u32.totalorder %s3764_s14, %s4783_s2 }
 0x132   :  { %p3770_p8 = pnand %p3768_p7, %p3765_p6 }
 0x134   :  { %3773 = shalt.err (!%p3770_p8)
}
 0x135   :  { %s3774_s4 = scalar_lea.vmem %s4319_s27, 1024  ;;  %p3779_p10 = scmp.lt.s32.totalorder %s4319_s27, %s4319_s27 }
 0x136   :  { %p3775_p9 = scmp.ne.s32.totalorder %s4319_s27, %s3774_s4  ;;  %p3780_p11 = scmp.lt.s32.totalorder %s3774_s4, %s3774_s4 }
 0x138   :  { %p3781_p12 = por %p3780_p11, %p3779_p10 }
 0x13a   :  { %p3782_p13 = pnand %p3781_p12, %p3775_p9 }
 0x13c   :  { %3785 = shalt.err (!%p3782_p13)
}
 0x13d   :  { %119 = dma.hbm_to_vmem [thread:$0]  %s4783_s2, 1024, %s4319_s27, [#allocation11], %s3972_s1, %s3972_s1, %s3973_s5  }
 0x13e   :  { %s3980_s3 = smov [#allocation15]   ;;  %s3981_s6 = smov [#allocation18]  }
 0x13f   :  { %s135_s28 = sshll.u32 %s3980_s3, 4  ;;  %s160_s0 = sshll.u32 %s3981_s6, 4  ;;  %s136_s28 = int_to_ptr.vmem [resolvable:$true] %s135_s28  ;;  %s161_s0 = int_to_ptr.vmem [resolvable:$true] %s160_s0 }
 0x140   :  { %s4784_s10 = sld [smem:[#allocation53_spill]] }
 0x146   :  { %s3786_s7 = scalar_lea.hbm %s4784_s10, 1024 }
 0x147   :  { %p3787_p0 = scmp.ne.s32.totalorder %s4784_s10, %s3786_s7  ;;  %p3790_p1 = scmp.lt.u32.totalorder %s3786_s7, %s4784_s10 }
 0x149   :  { %p3792_p2 = pnand %p3790_p1, %p3787_p0 }
 0x14b   :  { %3795 = shalt.err (!%p3792_p2)
}
 0x14c   :  { %s3796_s27 = scalar_lea.vmem %s136_s28, 1024  ;;  %p3801_p4 = scmp.lt.s32.totalorder %s136_s28, %s136_s28 }
 0x14d   :  { %p3797_p3 = scmp.ne.s32.totalorder %s136_s28, %s3796_s27  ;;  %p3802_p5 = scmp.lt.s32.totalorder %s3796_s27, %s3796_s27 }
 0x14f   :  { %p3803_p6 = por %p3802_p5, %p3801_p4 }
 0x151   :  { %p3804_p7 = pnand %p3803_p6, %p3797_p3 }
 0x153   :  { %3807 = shalt.err (!%p3804_p7)
}
 0x154   :  { %141 = dma.hbm_to_vmem [thread:$0]  %s4784_s10, 1024, %s136_s28, [#allocation14], %s3972_s1, %s3972_s1, %s3973_s5  }
 0x155   :  { %s4785_s30 = sld [smem:[#allocation56_spill]] }
 0x15b   :  { %s3808_s8 = scalar_lea.hbm %s4785_s30, 48 }
 0x15c   :  { %p3809_p8 = scmp.ne.s32.totalorder %s4785_s30, %s3808_s8  ;;  %p3812_p9 = scmp.lt.u32.totalorder %s3808_s8, %s4785_s30 }
 0x15e   :  { %p3814_p10 = pnand %p3812_p9, %p3809_p8 }
 0x160   :  { %3817 = shalt.err (!%p3814_p10)
}
 0x161   :  { %s3818_s7 = scalar_lea.vmem %s161_s0, 48  ;;  %s3822_s29 = scalar_lea.vmem %s161_s0, 64 }
 0x162   :  { %p3819_p11 = scmp.ne.s32.totalorder %s161_s0, %s3818_s7  ;;  %p3823_p12 = scmp.lt.s32.totalorder %s161_s0, %s161_s0 }
 0x163   :  { %p3824_p13 = scmp.lt.s32.totalorder %s3822_s29, %s3818_s7 }
 0x165   :  { %p3825_p0 = por %p3824_p13, %p3823_p12 }
 0x167   :  { %p3826_p1 = pnand %p3825_p0, %p3819_p11 }
 0x169   :  { %3829 = shalt.err (!%p3826_p1)
}
 0x16a   :  { %163 = dma.hbm_to_vmem [thread:$0]  %s4785_s30, 48, %s161_s0, [#allocation17]  }
 0x16b   :  { %s3982_s14 = smov [#allocation21]   ;;  %s3983_s11 = smov [#allocation24]  }
 0x16c   :  { %s182_s12 = sshll.u32 %s3982_s14, 4  ;;  %s204_s27 = sshll.u32 %s3983_s11, 4  ;;  %s183_s12 = int_to_ptr.vmem [resolvable:$true] %s182_s12  ;;  %s205_s27 = int_to_ptr.vmem [resolvable:$true] %s204_s27 }
 0x16d   :  { %s3830_s9 = scalar_lea.hbm %s4730_s13, 48 }
 0x16e   :  { %p3831_p2 = scmp.ne.s32.totalorder %s4730_s13, %s3830_s9  ;;  %p3834_p3 = scmp.lt.u32.totalorder %s3830_s9, %s4730_s13 }
 0x170   :  { %p3836_p4 = pnand %p3834_p3, %p3831_p2 }
 0x172   :  { %3839 = shalt.err (!%p3836_p4)
}
 0x173   :  { %s3840_s0 = scalar_lea.vmem %s183_s12, 48  ;;  %s3844_s30 = scalar_lea.vmem %s183_s12, 64 }
 0x174   :  { %p3841_p5 = scmp.ne.s32.totalorder %s183_s12, %s3840_s0  ;;  %p3845_p6 = scmp.lt.s32.totalorder %s183_s12, %s183_s12 }
 0x175   :  { %p3846_p7 = scmp.lt.s32.totalorder %s3844_s30, %s3840_s0 }
 0x177   :  { %p3847_p8 = por %p3846_p7, %p3845_p6 }
 0x179   :  { %p3848_p9 = pnand %p3847_p8, %p3841_p5 }
 0x17b   :  { %3851 = shalt.err (!%p3848_p9)
}
 0x17c   :  { %185 = dma.hbm_to_vmem [thread:$0]  %s4730_s13, 48, %s183_s12, [#allocation20]  }
 0x17d   :  { %s3852_s28 = scalar_lea.hbm %s4732_s15, 16 }
 0x17e   :  { %p3853_p10 = scmp.ne.s32.totalorder %s4732_s15, %s3852_s28  ;;  %p3856_p11 = scmp.lt.u32.totalorder %s3852_s28, %s4732_s15 }
 0x180   :  { %p3858_p12 = pnand %p3856_p11, %p3853_p10 }
 0x182   :  { %3861 = shalt.err (!%p3858_p12)
}
 0x183   :  { %s3862_s22 = scalar_lea.vmem %s205_s27, 16  ;;  %s3866_s9 = scalar_lea.vmem %s205_s27, 32 }
 0x184   :  { %p3863_p13 = scmp.ne.s32.totalorder %s205_s27, %s3862_s22  ;;  %p3867_p0 = scmp.lt.s32.totalorder %s205_s27, %s205_s27 }
 0x185   :  { %p3868_p1 = scmp.lt.s32.totalorder %s3866_s9, %s3862_s22 }
 0x187   :  { %p3869_p2 = por %p3868_p1, %p3867_p0 }
 0x189   :  { %p3870_p3 = pnand %p3869_p2, %p3863_p13 }
 0x18b   :  { %3873 = shalt.err (!%p3870_p3)
}
 0x18c   :  { %207 = dma.hbm_to_vmem [thread:$0]  %s4732_s15, 16, %s205_s27, [#allocation23]  }
 0x18d   :  { %s3984_s4 = smov [#allocation27]   ;;  %s3985_s3 = smov [#allocation30]  }
 0x18e   :  { %s225_s8 = sshll.u32 %s3984_s4, 4  ;;  %s247_s6 = sshll.u32 %s3985_s3, 4  ;;  %s226_s8 = int_to_ptr.vmem [resolvable:$true] %s225_s8  ;;  %s4407_s6 = int_to_ptr.vmem [resolvable:$true] %s247_s6 }
 0x18f   :  { %s3874_s17 = scalar_lea.hbm %s4735_s18, 128 }
 0x190   :  { %p3875_p4 = scmp.ne.s32.totalorder %s4735_s18, %s3874_s17  ;;  %p3878_p5 = scmp.lt.u32.totalorder %s3874_s17, %s4735_s18 }
 0x192   :  { %p3880_p6 = pnand %p3878_p5, %p3875_p4 }
 0x194   :  { %3883 = shalt.err (!%p3880_p6)
}
 0x195   :  { %s3884_s15 = scalar_lea.vmem %s226_s8, 128  ;;  %p3889_p8 = scmp.lt.s32.totalorder %s226_s8, %s226_s8 }
 0x196   :  { %p3885_p7 = scmp.ne.s32.totalorder %s226_s8, %s3884_s15  ;;  %p3890_p9 = scmp.lt.s32.totalorder %s3884_s15, %s3884_s15 }
 0x198   :  { %p3891_p10 = por %p3890_p9, %p3889_p8 }
 0x19a   :  { %p3892_p11 = pnand %p3891_p10, %p3885_p7 }
 0x19c   :  { %3895 = shalt.err (!%p3892_p11)
}
 0x19d   :  { %231 = dma.hbm_to_vmem [thread:$0]  %s4735_s18, 128, %s226_s8, [#allocation26], %s3972_s1, %s3972_s1, %s3973_s5  }
 0x19e   :  { %s3896_s2 = scalar_lea.hbm %s4737_s20, 1024 }
 0x19f   :  { %p3897_p12 = scmp.ne.s32.totalorder %s4737_s20, %s3896_s2  ;;  %p3900_p13 = scmp.lt.u32.totalorder %s3896_s2, %s4737_s20 }
 0x1a1   :  { %p3902_p0 = pnand %p3900_p13, %p3897_p12 }
 0x1a3   :  { %3905 = shalt.err (!%p3902_p0)
}
 0x1a4   :  { %s3906_s4 = scalar_lea.vmem %s4407_s6, 1024  ;;  %p3911_p2 = scmp.lt.s32.totalorder %s4407_s6, %s4407_s6 }
 0x1a5   :  { %p3907_p1 = scmp.ne.s32.totalorder %s4407_s6, %s3906_s4  ;;  %p3912_p3 = scmp.lt.s32.totalorder %s3906_s4, %s3906_s4 }
 0x1a7   :  { %p3913_p4 = por %p3912_p3, %p3911_p2 }
 0x1a9   :  { %p3914_p5 = pnand %p3913_p4, %p3907_p1 }
 0x1ab   :  { %3917 = shalt.err (!%p3914_p5)
}
 0x1ac   :  { %s3986_s18 = smov 128   ;;  %s3987_s1 = smov 8  }
 0x1ad   :  { %253 = dma.hbm_to_vmem [thread:$0]  %s4737_s20, 1024, %s4407_s6, [#allocation29], %s3986_s18, %s3986_s18, %s3987_s1  }
 0x1ae   :  { %s3988_s3 = smov [#allocation33]   ;;  %s3918_s19 = scalar_lea.hbm %s4740_s23, 16 }
 0x1af   :  { %s274_s0 = sshll.u32 %s3988_s3, 4  ;;  %p3919_p6 = scmp.ne.s32.totalorder %s4740_s23, %s3918_s19  ;;  %s275_s0 = int_to_ptr.vmem [resolvable:$true] %s274_s0 }
 0x1b0   :  { %p3922_p7 = scmp.lt.u32.totalorder %s3918_s19, %s4740_s23 }
 0x1b2   :  { %p3924_p8 = pnand %p3922_p7, %p3919_p6 }
 0x1b4   :  { %3927 = shalt.err (!%p3924_p8)
}
 0x1b5   :  { %s3928_s27 = scalar_lea.vmem %s275_s0, 16  ;;  %s3932_s20 = scalar_lea.vmem %s275_s0, 32 }
 0x1b6   :  { %p3929_p9 = scmp.ne.s32.totalorder %s275_s0, %s3928_s27  ;;  %p3933_p10 = scmp.lt.s32.totalorder %s275_s0, %s275_s0 }
 0x1b7   :  { %p3934_p11 = scmp.lt.s32.totalorder %s3932_s20, %s3928_s27 }
 0x1b9   :  { %p3935_p12 = por %p3934_p11, %p3933_p10 }
 0x1bb   :  { %p3936_p13 = pnand %p3935_p12, %p3929_p9 }
 0x1bd   :  { %3939 = shalt.err (!%p3936_p13)
}
 0x1be   :  { %277 = dma.hbm_to_vmem [thread:$0]  %s4740_s23, 16, %s275_s0, [#allocation32]  }
 0x1bf   :  { %3940 = dma.done.wait [#allocation3], 128  }
 0x1c0   :  { %3941 = vsyncadd [#allocation3], 4294967168 }
 0x1c1   :  { %3942 = dma.done.wait [#allocation5], 384  }
 0x1c2   :  { %3943 = vsyncadd [#allocation5], 4294966912 }
 0x1c3   :  { %3944 = dma.done.wait [#allocation8], 1040  }
 0x1c4   :  { %3945 = vsyncadd [#allocation8], 4294966256 }
 0x1c5   :  { %3946 = dma.done.wait [#allocation11], 1040  }
 0x1c6   :  { %3947 = vsyncadd [#allocation11], 4294966256 }
 0x1c7   :  { %3948 = dma.done.wait [#allocation14], 1040  }
 0x1c8   :  { %3949 = vsyncadd [#allocation14], 4294966256 }
 0x1c9   :  { %3950 = dma.done.wait [#allocation17], 64  }
 0x1ca   :  { %3951 = vsyncadd [#allocation17], 4294967232 }
 0x1cb   :  { %3952 = dma.done.wait [#allocation20], 9264  }
 0x1cc   :  { %3953 = vsyncadd [#allocation20], 4294958032 }
 0x1cd   :  { %3954 = dma.done.wait [#allocation23], 3088  }
 0x1ce   :  { %3955 = vsyncadd [#allocation23], 4294964208 }
 0x1cf   :  { %3956 = dma.done.wait [#allocation26], 144  }
 0x1d0   :  { %3957 = vsyncadd [#allocation26], 4294967152 }
 0x1d1   :  { %3958 = dma.done.wait [#allocation29], 1040  }
 0x1d2   :  { %3959 = vsyncadd [#allocation29], 4294966256 }
 0x1d3   :  { %3960 = dma.done.wait [#allocation32], 2064  }
 0x1d4   :  { %3961 = vsyncadd [#allocation32], 4294965232  ;;  %v3989_v0 = vmov 0.0   ;;  %vm3990_vm0 = vmmov 0   ;;  %v3251_v1 = vld [vmem:[#allocation6] sm:$0xff]   ;;  %v3252_v2 = vld [vmem:[#allocation6 + $0x8] sm:$0xff]  }
 0x1d5   :  { %3023 = vmatprep.subr.bf16.mxu1 %v3989_v0  ;;  %3027 = vmatprep.mubr.msk.bf16.mxu1 %vm3990_vm0, %v3989_v0  ;;  %v351_v3 = vld [vmem:[#allocation2] sm:$0xff]  ;;  %vm376_vm1 = vcmask 261120   ;;  %v3254_v6 = vld [vmem:[#allocation9 + $0x8] sm:$0xff]   ;;  %v3255_v7 = vld [vmem:[#allocation9 + $0x10] sm:$0xff]   ;;  %s4786_s11 = sld [smem:[#allocation55_spill]]  ;;  %vm2126_vm15 = vcmask 130048  }
 0x1d6   :  { %3051 = vmatprep.subr.bf16.mxu0 %v3989_v0  ;;  %3067 = vmatprep.mubr.msk.bf16.mxu0 %vm3990_vm0, %v3989_v0  ;;  %v352_v4 = vpack.c.bf16 %v351_v3, %v351_v3  ;;  %v3253_v5 = vld [vmem:[#allocation9] sm:$0xff]   ;;  %v3256_v8 = vld [vmem:[#allocation9 + $0x18] sm:$0xff]   ;;  %v3258_v10 = vld [vmem:[#allocation9 + $0x28] sm:$0xff]   ;;  %s4787_s0 = sld [smem:[#allocation58_spill]]  ;;  %s4788_s30 = sld [smem:[#allocation59_spill]] }
 0x1d7   :  { %3024 = vmatpush3.bf16.msra.mxu1 %v3251_v1  ;;  %v3257_v9 = vld [vmem:[#allocation9 + $0x20] sm:$0xff]   ;;  %v3259_v11 = vld [vmem:[#allocation9 + $0x30] sm:$0xff]   ;;  %v3260_v12 = vld [vmem:[#allocation9 + $0x38] sm:$0xff]  }
 0x1d8   :  { %3025 = vmatprep.subr.bf16.mxu1 %v3989_v0  ;;  %v3261_v13 = vld [vmem:[#allocation12] sm:$0xff]   ;;  %v3262_v14 = vld [vmem:[#allocation12 + $0x8] sm:$0xff]   ;;  %v3263_v15 = vld [vmem:[#allocation12 + $0x10] sm:$0xff]  }
 0x1d9   :  { %3052 = vmatpush3.bf16.msra.mxu0 %v3261_v13  ;;  %v3264_v16 = vld [vmem:[#allocation12 + $0x18] sm:$0xff]   ;;  %v3265_v17 = vld [vmem:[#allocation12 + $0x20] sm:$0xff]   ;;  %v3266_v18 = vld [vmem:[#allocation12 + $0x28] sm:$0xff]  }
 0x1da   :  { %3053 = vmatprep.subr.bf16.mxu0 %v3989_v0  ;;  %v2670_v19 = vld [vmem:[#allocation7] ss:$0 sm:$0xff]  ;;  %v3267_v28 = vld [vmem:[#allocation12 + $0x30] sm:$0xff]   ;;  %v3269_v30 = vld [vmem:[#allocation15] sm:$0xff]  }
 0x1db   :  { %3026 = vmatpush3.bf16.msra.mxu1 %v3252_v2  ;;  %v3268_v29 = vld [vmem:[#allocation12 + $0x38] sm:$0xff]   ;;  %v3270_v31 = vld [vmem:[#allocation15 + $0x8] sm:$0xff]   ;;  %v3273_v34 = vld [vmem:[#allocation15 + $0x20] sm:$0xff]  }
 0x1dc   :  { %3031 = vmatprep.subr.bf16.mxu1 %v3989_v0  ;;  %v3271_v32 = vld [vmem:[#allocation15 + $0x10] sm:$0xff]   ;;  %v3272_v33 = vld [vmem:[#allocation15 + $0x18] sm:$0xff]   ;;  %v3274_v35 = vld [vmem:[#allocation15 + $0x28] sm:$0xff]  }
 0x1dd   :  { %3054 = vmatpush3.bf16.msra.mxu0 %v3262_v14  ;;  %v2674_v36 = vld [vmem:[#allocation10] ss:$0 sm:$0xff]  ;;  %v3275_v45 = vld [vmem:[#allocation15 + $0x30] sm:$0xff]   ;;  %v3279_v48 = vld [vmem:[%s4786_s11 + $0x4] ss:$12 sps:$4 sm:$0xff]  }
 0x1de   :  { %3028 = vmatmul.mubr.msk.bf16.vlgmr.msra.gmra.mrb[0].mxu1 %vm376_vm1, %v352_v4  ;;  %3055 = vmatprep.subr.bf16.mxu0 %v3989_v0  ;;  %v3276_v46 = vld [vmem:[#allocation15 + $0x38] sm:$0xff]   ;;  %v3291_v53 = vld [vmem:[%s4786_s11 + $0x4c] ss:$12 sps:$4 sm:$0xff]   ;;  %v3289_v54 = vld [vmem:[%s4786_s11 + $0x48] ss:$12 sps:$4 sm:$0xff]   ;;  %vm2232_vm1 = vcmask 523264  }
 0x1df   :  { %3032 = vmatpush3.bf16.msra.mxu1 %v3253_v5  ;;  %3047 = vmatprep.mubr.msk.bf16.mxu1 %vm3990_vm0, %v3989_v0  ;;  %v3277_v47 = vld [vmem:[%s4786_s11] ss:$12 sps:$4 sm:$0xff]   ;;  %v3283_v49 = vld [vmem:[%s4786_s11 + $0x1c] ss:$12 sps:$4 sm:$0xff]   ;;  %v3281_v50 = vld [vmem:[%s4786_s11 + $0x18] ss:$12 sps:$4 sm:$0xff]  }
 0x1e0   :  { %3033 = vmatprep.subr.bf16.mxu1 %v3989_v0  ;;  %v3287_v51 = vld [vmem:[%s4786_s11 + $0x34] ss:$12 sps:$4 sm:$0xff]   ;;  %v3285_v52 = vld [vmem:[%s4786_s11 + $0x30] ss:$12 sps:$4 sm:$0xff]   ;;  %v3297_v58 = vld [vmem:[%s4786_s11 + $0x78] ss:$12 sps:$4 sm:$0xff]  }
 0x1e1   :  { %3056 = vmatpush3.bf16.msra.mxu0 %v3263_v15  ;;  %v3295_v55 = vld [vmem:[%s4786_s11 + $0x64] ss:$12 sps:$4 sm:$0xff]   ;;  %v3293_v56 = vld [vmem:[%s4786_s11 + $0x60] ss:$12 sps:$4 sm:$0xff]   ;;  %v3299_v57 = vld [vmem:[%s4786_s11 + $0x7c] ss:$12 sps:$4 sm:$0xff]  }
 0x1e2   :  { %3057 = vmatprep.subr.bf16.mxu0 %v3989_v0  ;;  %v2683_v59 = vld [vmem:[#allocation13] ss:$0 sm:$0xff]  ;;  %v3280_v4 = vld [vmem:[%s4786_s11 + $0x8] ss:$12 sps:$4 sm:$0xff]   ;;  %v3307_v14 = vld [vmem:[%s4786_s11 + $0xac] ss:$12 sps:$4 sm:$0xff]  }
 0x1e3   :  { %3034 = vmatpush3.bf16.msra.mxu1 %v3254_v6  ;;  %v3284_v6 = vld [vmem:[%s4786_s11 + $0x20] ss:$12 sps:$4 sm:$0xff]   ;;  %v3304_v13 = vld [vmem:[%s4786_s11 + $0x98] ss:$12 sps:$4 sm:$0xff]   ;;  %v3305_v15 = vld [vmem:[%s4786_s11 + $0xa8] ss:$12 sps:$4 sm:$0xff]  }
 0x1e4   :  { %3035 = vmatprep.subr.bf16.mxu1 %v3989_v0 }
 0x1e5   :  { %3058 = vmatpush3.bf16.msra.mxu0 %v3264_v16  ;;  %v3308_v16 = vld [vmem:[%s4786_s11 + $0xb0] ss:$12 sps:$4 sm:$0xff]  }
 0x1e6   :  { %3059 = vmatprep.subr.bf16.mxu0 %v3989_v0 }
 0x1e7   :  { %3036 = vmatpush3.bf16.msra.mxu1 %v3255_v7  ;;  %v3288_v7 = vld [vmem:[%s4786_s11 + $0x38] ss:$12 sps:$4 sm:$0xff]  }
 0x1e8   :  { %3037 = vmatprep.subr.bf16.mxu1 %v3989_v0 }
 0x1e9   :  { %3060 = vmatpush3.bf16.msra.mxu0 %v3265_v17  ;;  %v3991_v17 = vmov 0  }
 0x1ea   :  { %3061 = vmatprep.subr.bf16.mxu0 %v3989_v0 }
 0x1eb   :  { %3038 = vmatpush3.bf16.msra.mxu1 %v3256_v8  ;;  %v3292_v8 = vld [vmem:[%s4786_s11 + $0x50] ss:$12 sps:$4 sm:$0xff]  }
 0x1ec   :  { %3039 = vmatprep.subr.bf16.mxu1 %v3989_v0 }
 0x1ed   :  { %3062 = vmatpush3.bf16.msra.mxu0 %v3266_v18  ;;  %v3311_v18 = vld [vmem:[#allocation19 + $0x4] ss:$12 sps:$4 sm:$0xff]  }
 0x1ee   :  { %3063 = vmatprep.subr.bf16.mxu0 %v3989_v0 }
 0x1ef   :  { %3040 = vmatpush3.bf16.msra.mxu1 %v3257_v9  ;;  %v3296_v9 = vld [vmem:[%s4786_s11 + $0x68] ss:$12 sps:$4 sm:$0xff]  }
 0x1f0   :  { %3041 = vmatprep.subr.bf16.mxu1 %v3989_v0 }
 0x1f1   :  { %3064 = vmatpush3.bf16.msra.mxu0 %v3267_v28 }
 0x1f2   :  { %3065 = vmatprep.subr.bf16.mxu0 %v3989_v0 }
 0x1f3   :  { %3042 = vmatpush3.bf16.msra.mxu1 %v3258_v10  ;;  %v3300_v10 = vld [vmem:[%s4786_s11 + $0x80] ss:$12 sps:$4 sm:$0xff]  }
 0x1f4   :  { %3043 = vmatprep.subr.bf16.mxu1 %v3989_v0 }
 0x1f5   :  { %3066 = vmatpush3.bf16.msra.mxu0 %v3268_v29  ;;  %v3309_v29 = vld [vmem:[#allocation19] ss:$12 sps:$4 sm:$0xff]  }
 0x1f6   :  { %949 = vmatprep.subr.bf16.mxu0 %v3279_v48  ;;  %v3357_v48 = vld [vmem:[#allocation19 + $0x68] ss:$12 sps:$4 sm:$0xff]  }
 0x1f7   :  { %3044 = vmatpush3.bf16.msra.mxu1 %v3259_v11  ;;  %v3303_v11 = vld [vmem:[%s4786_s11 + $0x94] ss:$12 sps:$4 sm:$0xff]  }
 0x1f8   :  { %3045 = vmatprep.subr.bf16.mxu1 %v3989_v0 }
 0x1fb   :  { %3046 = vmatpush3.bf16.msra.mxu1 %v3260_v12  ;;  %v3301_v12 = vld [vmem:[%s4786_s11 + $0x90] ss:$12 sps:$4 sm:$0xff]  }
 0x1fc   :  { %3071 = vmatprep.subr.bf16.mxu1 %v3989_v0 }
 0x2b1   :  { %v414_v20 = vpop.f32.mrb[0].mxu1 }
 0x2b2   :  { %v415_v21 = vadd.f32 %v2670_v19, %v414_v20  ;;  %v3029_v22 = vpop.f32.mrb[1].mxu1  ;;  %v3336_v19 = vld [vmem:[#allocation19 + $0xc8] ss:$12 sps:$4 sm:$0xff]   ;;  %v2692_v20 = vld [vmem:[#allocation16] ss:$0 sm:$0xff] }
 0x2b3   :  { %v417_v23 = vpop.f32.mrb[2].mxu1 }
 0x2b4   :  { %vm420_vm2 = vcmp.gt.f32.partialorder %v415_v21, 0.0  ;;  %v421_v24 = vmul.f32 0.01, %v415_v21  ;;  %v3030_v25 = vpop.f32.mrb[3].mxu1 }
 0x2b6   :  { %v422_v26 = vsel %vm420_vm2, %v415_v21, %v421_v24 }
 0x2b7   :  { %v423_v27 = vpack.c.bf16 %v422_v26, %v422_v26 }
 0x2b9   :  { %3048 = vmatmul.mubr.bf16.vlgmr.msra.gmra.mrb[4].mxu1 %v423_v27 }
 0x2ba   :  { %3087 = vmatprep.mubr.msk.bf16.mxu1 %vm3990_vm0, %v3989_v0  ;;  %3072 = vmatpush3.bf16.msra.mxu1 %v3269_v30 }
 0x2bb   :  { %3073 = vmatprep.subr.bf16.mxu1 %v3989_v0 }
 0x2be   :  { %3074 = vmatpush3.bf16.msra.mxu1 %v3270_v31  ;;  %v3337_v31 = vld [vmem:[#allocation19 + $0x8] ss:$12 sps:$4 sm:$0xff]  }
 0x2bf   :  { %3075 = vmatprep.subr.bf16.mxu1 %v3989_v0 }
 0x2c2   :  { %3076 = vmatpush3.bf16.msra.mxu1 %v3271_v32  ;;  %v3314_v32 = vld [vmem:[#allocation19 + $0x1c] ss:$12 sps:$4 sm:$0xff]  }
 0x2c3   :  { %3077 = vmatprep.subr.bf16.mxu1 %v3989_v0 }
 0x2c6   :  { %3078 = vmatpush3.bf16.msra.mxu1 %v3272_v33  ;;  %v3341_v33 = vld [vmem:[#allocation19 + $0xe0] ss:$12 sps:$4 sm:$0xff]  }
 0x2c7   :  { %3079 = vmatprep.subr.bf16.mxu1 %v3989_v0 }
 0x2ca   :  { %3080 = vmatpush3.bf16.msra.mxu1 %v3273_v34 }
 0x2cb   :  { %3081 = vmatprep.subr.bf16.mxu1 %v3989_v0 }
 0x2ce   :  { %3082 = vmatpush3.bf16.msra.mxu1 %v3274_v35  ;;  %v3312_v35 = vld [vmem:[#allocation19 + $0x18] ss:$12 sps:$4 sm:$0xff]  }
 0x2cf   :  { %3083 = vmatprep.subr.bf16.mxu1 %v3989_v0 }
 0x2d2   :  { %3084 = vmatpush3.bf16.msra.mxu1 %v3275_v45  ;;  %v3323_v45 = vld [vmem:[#allocation19 + $0x64] ss:$12 sps:$4 sm:$0xff]  }
 0x2d3   :  { %3085 = vmatprep.subr.bf16.mxu1 %v3989_v0 }
 0x2d6   :  { %3086 = vmatpush3.bf16.msra.mxu1 %v3276_v46  ;;  %v3356_v46 = vld [vmem:[#allocation19 + $0x128] ss:$12 sps:$4 sm:$0xff]  }
 0x2d7   :  { %3091 = vmatprep.subr.bf16.mxu1 %v3989_v0 }
 0x38c   :  { %v529_v37 = vpop.f32.mrb[4].mxu1 }
 0x38d   :  { %v530_v38 = vadd.f32 %v2674_v36, %v529_v37  ;;  %v3049_v39 = vpop.f32.mrb[5].mxu1  ;;  %v3342_v36 = vld [vmem:[#allocation19 + $0x20] ss:$12 sps:$4 sm:$0xff]  }
 0x38e   :  { %v532_v40 = vpop.f32.mrb[6].mxu1  ;;  %v3317_v37 = vld [vmem:[#allocation19 + $0x34] ss:$12 sps:$4 sm:$0xff]   ;;  %v3315_v39 = vld [vmem:[#allocation19 + $0x30] ss:$12 sps:$4 sm:$0xff]  }
 0x38f   :  { %vm535_vm3 = vcmp.gt.f32.partialorder %v530_v38, 0.0  ;;  %v536_v41 = vmul.f32 0.01, %v530_v38  ;;  %v3050_v42 = vpop.f32.mrb[7].mxu1  ;;  %v3347_v40 = vld [vmem:[#allocation19 + $0x38] ss:$12 sps:$4 sm:$0xff]  }
 0x390   :  { %v3351_v42 = vld [vmem:[#allocation19 + $0x110] ss:$12 sps:$4 sm:$0xff]  }
 0x391   :  { %v537_v43 = vsel %vm535_vm3, %v530_v38, %v536_v41  ;;  %v3346_v38 = vld [vmem:[#allocation19 + $0xf8] ss:$12 sps:$4 sm:$0xff]  }
 0x392   :  { %v538_v44 = vpack.c.bf16 %v537_v43, %v537_v43  ;;  %v3320_v41 = vld [vmem:[#allocation19 + $0x4c] ss:$12 sps:$4 sm:$0xff]   ;;  %v3318_v43 = vld [vmem:[#allocation19 + $0x48] ss:$12 sps:$4 sm:$0xff]  }
 0x394   :  { %3068 = vmatmul.mubr.bf16.vlgmr.msra.gmra.mrb[0].mxu0 %v538_v44  ;;  %v3352_v44 = vld [vmem:[#allocation19 + $0x50] ss:$12 sps:$4 sm:$0xff]  }
 0x395   :  { %950 = vmatpush1.bf16.msra.mxu0 %v3277_v47  ;;  %981 = vmatprep.mubr.bf16.mxu0 %v3991_v17  ;;  %v3321_v47 = vld [vmem:[#allocation19 + $0x60] ss:$12 sps:$4 sm:$0xff]  }
 0x396   :  { %951 = vmatprep.subr.bf16.mxu0 %v3283_v49  ;;  %v3326_v49 = vld [vmem:[#allocation19 + $0x7c] ss:$12 sps:$4 sm:$0xff]  }
 0x399   :  { %952 = vmatpush1.bf16.msra.mxu0 %v3281_v50  ;;  %v3361_v50 = vld [vmem:[#allocation19 + $0x140] ss:$12 sps:$4 sm:$0xff]  }
 0x39a   :  { %953 = vmatprep.subr.bf16.mxu0 %v3287_v51  ;;  %v3324_v51 = vld [vmem:[#allocation19 + $0x78] ss:$12 sps:$4 sm:$0xff]  }
 0x39d   :  { %954 = vmatpush1.bf16.msra.mxu0 %v3285_v52  ;;  %v3362_v52 = vld [vmem:[#allocation19 + $0x80] ss:$12 sps:$4 sm:$0xff]  }
 0x39e   :  { %955 = vmatprep.subr.bf16.mxu0 %v3291_v53  ;;  %v3329_v53 = vld [vmem:[#allocation19 + $0x94] ss:$12 sps:$4 sm:$0xff]  }
 0x3a1   :  { %956 = vmatpush1.bf16.msra.mxu0 %v3289_v54  ;;  %v3327_v54 = vld [vmem:[#allocation19 + $0x90] ss:$12 sps:$4 sm:$0xff]  }
 0x3a2   :  { %957 = vmatprep.subr.bf16.mxu0 %v3295_v55  ;;  %v3332_v55 = vld [vmem:[#allocation19 + $0xac] ss:$12 sps:$4 sm:$0xff]  }
 0x3a5   :  { %958 = vmatpush1.bf16.msra.mxu0 %v3293_v56  ;;  %v3330_v56 = vld [vmem:[#allocation19 + $0xa8] ss:$12 sps:$4 sm:$0xff]  }
 0x3a6   :  { %959 = vmatprep.subr.bf16.mxu0 %v3299_v57  ;;  %v3335_v57 = vld [vmem:[#allocation19 + $0xc4] ss:$12 sps:$4 sm:$0xff]  }
 0x3a9   :  { %960 = vmatpush1.bf16.msra.mxu0 %v3297_v58  ;;  %v3333_v58 = vld [vmem:[#allocation19 + $0xc0] ss:$12 sps:$4 sm:$0xff]  }
 0x3aa   :  { %961 = vmatprep.subr.bf16.mxu0 %v3303_v11  ;;  %v3371_v11 = vld [vmem:[#allocation19 + $0x170] ss:$12 sps:$4 sm:$0xff]  }
 0x3ad   :  { %962 = vmatpush1.bf16.msra.mxu0 %v3301_v12  ;;  %v3368_v12 = vld [vmem:[#allocation19 + $0x168] ss:$12 sps:$4 sm:$0xff]  }
 0x3ae   :  { %963 = vmatprep.subr.bf16.mxu0 %v3307_v14  ;;  %v3375_v14 = vld [vmem:[#allocation19 + $0x184] ss:$12 sps:$4 sm:$0xff]  }
 0x3b1   :  { %964 = vmatpush1.bf16.msra.mxu0 %v3305_v15  ;;  %v806_v15 = vlaneseq }
 0x3b2   :  { %1539 = vmatprep.subr.bf16.mxu0 %v3311_v18 }
 0x467   :  { %v644_v60 = vpop.f32.mrb[0].mxu0 }
 0x468   :  { %v645_v61 = vadd.f32 %v2683_v59, %v644_v60  ;;  %v3069_v62 = vpop.f32.mrb[1].mxu0  ;;  %v3340_v59 = vld [vmem:[#allocation19 + $0xdc] ss:$12 sps:$4 sm:$0xff]   ;;  %v3338_v60 = vld [vmem:[#allocation19 + $0xd8] ss:$12 sps:$4 sm:$0xff]  }
 0x469   :  { %v647_v63 = vpop.f32.mrb[2].mxu0  ;;  %v3343_v62 = vld [vmem:[#allocation19 + $0xf0] ss:$12 sps:$4 sm:$0xff]  }
 0x46a   :  { %vm650_vm4 = vcmp.gt.f32.partialorder %v645_v61, 0.0  ;;  %v651_v1 = vmul.f32 0.01, %v645_v61  ;;  %v3070_v2 = vpop.f32.mrb[3].mxu0  ;;  %v3350_v63 = vld [vmem:[#allocation19 + $0x10c] ss:$12 sps:$4 sm:$0xff]  }
 0x46b   :  { %v3355_v2 = vld [vmem:[#allocation19 + $0x124] ss:$12 sps:$4 sm:$0xff]  }
 0x46c   :  { %v652_v3 = vsel %vm650_vm4, %v645_v61, %v651_v1  ;;  %v3345_v61 = vld [vmem:[#allocation19 + $0xf4] ss:$12 sps:$4 sm:$0xff]  }
 0x46d   :  { %v653_v5 = vpack.c.bf16 %v652_v3, %v652_v3  ;;  %v3348_v1 = vld [vmem:[#allocation19 + $0x108] ss:$12 sps:$4 sm:$0xff]   ;;  %v3353_v3 = vld [vmem:[#allocation19 + $0x120] ss:$12 sps:$4 sm:$0xff]  }
 0x46f   :  { %3088 = vmatmul.mubr.bf16.vlgmr.msra.gmra.mrb[8].mxu1 %v653_v5  ;;  %v3358_v5 = vld [vmem:[#allocation19 + $0x138] ss:$12 sps:$4 sm:$0xff]  }
 0x470   :  { %3092 = vmatpush3.bf16.msra.mxu1 %v3280_v4  ;;  %3107 = vmatprep.mubr.msk.bf16.mxu1 %vm3990_vm0, %v3989_v0  ;;  %v3360_v4 = vld [vmem:[#allocation19 + $0x13c] ss:$12 sps:$4 sm:$0xff]  }
 0x471   :  { %3093 = vmatprep.subr.bf16.mxu1 %v3989_v0 }
 0x474   :  { %3094 = vmatpush3.bf16.msra.mxu1 %v3284_v6  ;;  %v3365_v6 = vld [vmem:[#allocation19 + $0x154] ss:$12 sps:$4 sm:$0xff]  }
 0x475   :  { %3095 = vmatprep.subr.bf16.mxu1 %v3989_v0 }
 0x478   :  { %3096 = vmatpush3.bf16.msra.mxu1 %v3288_v7  ;;  %v3366_v7 = vld [vmem:[#allocation19 + $0x158] ss:$12 sps:$4 sm:$0xff]  }
 0x479   :  { %3097 = vmatprep.subr.bf16.mxu1 %v3989_v0 }
 0x47c   :  { %3098 = vmatpush3.bf16.msra.mxu1 %v3292_v8  ;;  %v3363_v8 = vld [vmem:[#allocation19 + $0x150] ss:$12 sps:$4 sm:$0xff]  }
 0x47d   :  { %3099 = vmatprep.subr.bf16.mxu1 %v3989_v0 }
 0x480   :  { %3100 = vmatpush3.bf16.msra.mxu1 %v3296_v9  ;;  %v3367_v9 = vld [vmem:[#allocation19 + $0x98] ss:$12 sps:$4 sm:$0xff]  }
 0x481   :  { %3101 = vmatprep.subr.bf16.mxu1 %v3989_v0 }
 0x484   :  { %3102 = vmatpush3.bf16.msra.mxu1 %v3300_v10  ;;  %v3370_v10 = vld [vmem:[#allocation19 + $0x16c] ss:$12 sps:$4 sm:$0xff]  }
 0x485   :  { %3103 = vmatprep.subr.bf16.mxu1 %v3989_v0 }
 0x488   :  { %3104 = vmatpush3.bf16.msra.mxu1 %v3304_v13  ;;  %v3372_v13 = vld [vmem:[#allocation19 + $0xb0] ss:$12 sps:$4 sm:$0xff]  }
 0x489   :  { %3105 = vmatprep.subr.bf16.mxu1 %v3989_v0 }
 0x48c   :  { %3106 = vmatpush3.bf16.msra.mxu1 %v3308_v16  ;;  %v4571_v16 = vshrl.u32 %v806_v15, 7  ;;  %v3414_v15 = vld [vmem:[#allocation22 + $0x98] sm:$0xff]  }
 0x48d   :  { %2914 = vmatprep.subr.bf16.mxu1 %v3336_v19  ;;  %v804_v19 = vld [vmem:[#allocation18] sm:$0x7] }
 0x48e   :  { %v4574_v18 = vsub.s32 0, %v4571_v16 }
 0x542   :  { %v759_v21 = vpop.f32.mrb[8].mxu1 }
 0x543   :  { %v760_v22 = vadd.f32 %v2692_v20, %v759_v21  ;;  %v3089_v23 = vpop.f32.mrb[9].mxu1  ;;  %v4577_v20 = vsub.s32 1, %v4571_v16  ;;  %v809_v21 = vrot.slane %v804_v19, %v4574_v18 }
 0x544   :  { %v762_v24 = vpop.f32.mrb[10].mxu1 }
 0x545   :  { %vm765_vm5 = vcmp.gt.f32.partialorder %v760_v22, 0.0  ;;  %v766_v25 = vmul.f32 0.01, %v760_v22  ;;  %v3090_v26 = vpop.f32.mrb[11].mxu1 }
 0x547   :  { %v767_v27 = vsel %vm765_vm5, %v760_v22, %v766_v25  ;;  %v813_v22 = vrot.slane %v804_v19, %v4577_v20 }
 0x548   :  { %v768_v28 = vpack.c.bf16 %v767_v27, %v767_v27 }
 0x54a   :  { %vm769_vm6 = vcmp.gt.bf16.partialorder %v768_v28, 0  ;;  %v770_v30 = vmul.bf16 1009007652, %v768_v28 }
 0x54c   :  { %v771_v34 = vsel %vm769_vm6, %v768_v28, %v770_v30 }
 0x54d   :  { %982 = vmatmul.mubr.bf16.vlgmr.msra.gmra.mrb[4].mxu0 %v771_v34  ;;  %3108 = vmatmul.mubr.bf16.vlgmr.msra.gmra.mrb[12].mxu1 %v771_v34 }
 0x54e   :  { %1540 = vmatpush1.bf16.msra.mxu0 %v3309_v29  ;;  %2915 = vmatpush3.bf16.msra.mxu1 %v3337_v31 }
 0x54f   :  { %1541 = vmatprep.subr.bf16.mxu0 %v3314_v32  ;;  %2916 = vmatprep.subr.bf16.mxu1 %v3341_v33 }
 0x552   :  { %1542 = vmatpush1.bf16.msra.mxu0 %v3312_v35  ;;  %2917 = vmatpush3.bf16.msra.mxu1 %v3342_v36 }
 0x553   :  { %1543 = vmatprep.subr.bf16.mxu0 %v3317_v37  ;;  %2918 = vmatprep.subr.bf16.mxu1 %v3346_v38  ;;  %v3373_v38 = vld [vmem:[#allocation19 + $0x180] ss:$12 sps:$4 sm:$0xff]  }
 0x556   :  { %1544 = vmatpush1.bf16.msra.mxu0 %v3315_v39  ;;  %2919 = vmatpush3.bf16.msra.mxu1 %v3347_v40  ;;  %v3376_v39 = vld [vmem:[#allocation19 + $0x188] ss:$12 sps:$4 sm:$0xff]  }
 0x557   :  { %1545 = vmatprep.subr.bf16.mxu0 %v3320_v41  ;;  %2920 = vmatprep.subr.bf16.mxu1 %v3351_v42  ;;  %v3379_v41 = vld [vmem:[#allocation19 + $0x19c] ss:$12 sps:$4 sm:$0xff]   ;;  %v3377_v42 = vld [vmem:[#allocation19 + $0x198] ss:$12 sps:$4 sm:$0xff]  }
 0x55a   :  { %1546 = vmatpush1.bf16.msra.mxu0 %v3318_v43  ;;  %2921 = vmatpush3.bf16.msra.mxu1 %v3352_v44  ;;  %v3380_v43 = vld [vmem:[#allocation19 + $0x1a0] ss:$12 sps:$4 sm:$0xff]  }
 0x55b   :  { %1547 = vmatprep.subr.bf16.mxu0 %v3323_v45  ;;  %2922 = vmatprep.subr.bf16.mxu1 %v3356_v46  ;;  %v3383_v44 = vld [vmem:[#allocation19 + $0x1b4] ss:$12 sps:$4 sm:$0xff]   ;;  %v3381_v45 = vld [vmem:[#allocation19 + $0x1b0] ss:$12 sps:$4 sm:$0xff]   ;;  %v3384_v46 = vld [vmem:[#allocation19 + $0x1b8] ss:$12 sps:$4 sm:$0xff]  }
 0x55e   :  { %1548 = vmatpush1.bf16.msra.mxu0 %v3321_v47  ;;  %2923 = vmatpush3.bf16.msra.mxu1 %v3357_v48  ;;  %v3387_v47 = vld [vmem:[#allocation19 + $0x1cc] ss:$12 sps:$4 sm:$0xff]   ;;  %v3385_v48 = vld [vmem:[#allocation19 + $0x1c8] ss:$12 sps:$4 sm:$0xff]  }
 0x55f   :  { %1549 = vmatprep.subr.bf16.mxu0 %v3326_v49  ;;  %2924 = vmatprep.subr.bf16.mxu1 %v3361_v50  ;;  %v3388_v49 = vld [vmem:[#allocation19 + $0x1d0] ss:$12 sps:$4 sm:$0xff]  }
 0x560   :  { %v3391_v50 = vld [vmem:[#allocation19 + $0x1e4] ss:$12 sps:$4 sm:$0xff]  }
 0x562   :  { %1550 = vmatpush1.bf16.msra.mxu0 %v3324_v51  ;;  %2925 = vmatpush3.bf16.msra.mxu1 %v3362_v52  ;;  %v816_v51 = vsub.s32 2, %v4571_v16  ;;  %v3389_v52 = vld [vmem:[#allocation19 + $0x1e0] ss:$12 sps:$4 sm:$0xff]  }
 0x563   :  { %1551 = vmatprep.subr.bf16.mxu0 %v3329_v53  ;;  %2926 = vmatprep.subr.bf16.mxu1 %v3366_v7  ;;  %v3392_v53 = vld [vmem:[#allocation19 + $0x1e8] ss:$12 sps:$4 sm:$0xff]  }
 0x564   :  { %v3407_v7 = vld [vmem:[#allocation22] sm:$0xff]  }
 0x566   :  { %1552 = vmatpush1.bf16.msra.mxu0 %v3327_v54  ;;  %2927 = vmatpush3.bf16.msra.mxu1 %v3367_v9  ;;  %v3395_v54 = vld [vmem:[#allocation19 + $0x1fc] ss:$12 sps:$4 sm:$0xff]   ;;  %v3408_v9 = vld [vmem:[#allocation22 + $0x88] sm:$0xff]  }
 0x567   :  { %1553 = vmatprep.subr.bf16.mxu0 %v3332_v55  ;;  %2928 = vmatprep.subr.bf16.mxu1 %v3371_v11  ;;  %v817_v55 = vrot.slane %v804_v19, %v816_v51  ;;  %v3412_v11 = vld [vmem:[#allocation22 + $0x50] sm:$0xff]   ;;  %v3416_v19 = vld [vmem:[#allocation22 + $0x18] sm:$0xff]  }
 0x56a   :  { %1554 = vmatpush1.bf16.msra.mxu0 %v3330_v56  ;;  %2929 = vmatpush3.bf16.msra.mxu1 %v3372_v13  ;;  %v3393_v56 = vld [vmem:[#allocation19 + $0x1f8] ss:$12 sps:$4 sm:$0xff]  }
 0x56b   :  { %1555 = vmatprep.subr.bf16.mxu0 %v3335_v57  ;;  %3111 = vmatprep.subr.bf16.mxu1 %v3989_v0  ;;  %v3396_v57 = vld [vmem:[#allocation19 + $0x200] ss:$12 sps:$4 sm:$0xff]   ;;  %v3413_v13 = vld [vmem:[#allocation22 + $0x10] sm:$0xff]  }
 0x56e   :  { %1556 = vmatpush1.bf16.msra.mxu0 %v3333_v58  ;;  %v3399_v58 = vld [vmem:[#allocation19 + $0x214] ss:$12 sps:$4 sm:$0xff]  }
 0x56f   :  { %1557 = vmatprep.subr.bf16.mxu0 %v3340_v59 }
 0x572   :  { %1558 = vmatpush1.bf16.msra.mxu0 %v3338_v60  ;;  %v3397_v60 = vld [vmem:[#allocation19 + $0x210] ss:$12 sps:$4 sm:$0xff]  }
 0x573   :  { %1559 = vmatprep.subr.bf16.mxu0 %v3345_v61  ;;  %v3400_v61 = vld [vmem:[#allocation19 + $0x218] ss:$12 sps:$4 sm:$0xff]  }
 0x576   :  { %1560 = vmatpush1.bf16.msra.mxu0 %v3343_v62  ;;  %v3403_v62 = vld [vmem:[#allocation19 + $0x22c] ss:$12 sps:$4 sm:$0xff]  }
 0x577   :  { %1561 = vmatprep.subr.bf16.mxu0 %v3350_v63 }
 0x57a   :  { %1562 = vmatpush1.bf16.msra.mxu0 %v3348_v1  ;;  %v3401_v1 = vld [vmem:[#allocation19 + $0x228] ss:$12 sps:$4 sm:$0xff]  }
 0x57b   :  { %1563 = vmatprep.subr.bf16.mxu0 %v3355_v2  ;;  %v3404_v2 = vld [vmem:[#allocation19 + $0x230] ss:$12 sps:$4 sm:$0xff]  }
 0x57e   :  { %1564 = vmatpush1.bf16.msra.mxu0 %v3353_v3 }
 0x57f   :  { %1565 = vmatprep.subr.bf16.mxu0 %v3360_v4 }
 0x582   :  { %1566 = vmatpush1.bf16.msra.mxu0 %v3358_v5  ;;  %v3405_v5 = vld [vmem:[#allocation22 + $0x80] sm:$0xff]  }
 0x583   :  { %1567 = vmatprep.subr.bf16.mxu0 %v3365_v6  ;;  %v3406_v6 = vld [vmem:[#allocation22 + $0x40] sm:$0xff]  }
 0x586   :  { %1568 = vmatpush1.bf16.msra.mxu0 %v3363_v8  ;;  %v3409_v8 = vld [vmem:[#allocation22 + $0x48] sm:$0xff]  }
 0x587   :  { %1569 = vmatprep.subr.bf16.mxu0 %v3370_v10  ;;  %v3410_v10 = vld [vmem:[#allocation22 + $0x8] sm:$0xff]  }
 0x58a   :  { %1570 = vmatpush1.bf16.msra.mxu0 %v3368_v12  ;;  %v3411_v12 = vld [vmem:[#allocation22 + $0x90] sm:$0xff]  }
 0x58b   :  { %1580 = vmatprep.subr.bf16.mxu0 %v3375_v14  ;;  %v3415_v14 = vld [vmem:[#allocation22 + $0x58] sm:$0xff]  }
 0x620   :  { %v983_v23 = vpop.f32.mrb[4].mxu0  ;;  %v4581_v24 = vpop.f32.mrb[12].mxu1 }
 0x621   :  { %v984_v25 = vadd.f32 %v983_v23, %v809_v21  ;;  %v985_v26 = vpop.f32.mrb[5].mxu0  ;;  %v3109_v27 = vpop.f32.mrb[13].mxu1  ;;  %v1025_v59 = vadd.f32 %v4581_v24, %v817_v55  ;;  %v3418_v21 = vld [vmem:[#allocation22 + $0x60] sm:$0xff]   ;;  %v3421_v24 = vld [vmem:[#allocation22 + $0x68] sm:$0xff]  }
 0x622   :  { %v986_v28 = vadd.f32 %v985_v26, %v813_v22  ;;  %v987_v29 = vpop.f32.mrb[6].mxu0  ;;  %v1027_v30 = vpop.f32.mrb[14].mxu1  ;;  %v3417_v22 = vld [vmem:[#allocation22 + $0xa0] sm:$0xff]   ;;  %v3422_v26 = vld [vmem:[#allocation22 + $0x28] sm:$0xff]   ;;  %v3423_v27 = vld [vmem:[#allocation22 + $0xb0] sm:$0xff]  }
 0x623   :  { %vm1030_vm7 = vcmp.gt.f32.partialorder %v984_v25, 0.0  ;;  %v1033_v31 = vmul.f32 0.01, %v984_v25  ;;  %v988_v33 = vpop.f32.mrb[7].mxu0  ;;  %v3110_v34 = vpop.f32.mrb[15].mxu1  ;;  %vm1032_vm9 = vcmp.gt.f32.partialorder %v1025_v59, 0.0 }
 0x624   :  { %vm1031_vm8 = vcmp.gt.f32.partialorder %v986_v28, 0.0  ;;  %v1034_v32 = vmul.f32 0.01, %v986_v28  ;;  %v1035_v63 = vmul.f32 0.01, %v1025_v59  ;;  %v3419_v23 = vld [vmem:[#allocation22 + $0x20] sm:$0xff]  }
 0x625   :  { %v1036_v35 = vsel %vm1030_vm7, %v984_v25, %v1033_v31  ;;  %v3420_v25 = vld [vmem:[#allocation22 + $0xa8] sm:$0xff]   ;;  %v3425_v29 = vld [vmem:[#allocation22 + $0x30] sm:$0xff]   ;;  %v3426_v30 = vld [vmem:[#allocation22 + $0xb8] sm:$0xff]  }
 0x626   :  { %v1037_v36 = vsel %vm1031_vm8, %v986_v28, %v1034_v32  ;;  %v1039_v40 = vpack.c.bf16 %v1036_v35, %v1036_v35  ;;  %v1038_v3 = vsel %vm1032_vm9, %v1025_v59, %v1035_v63  ;;  %v3424_v28 = vld [vmem:[#allocation22 + $0x70] sm:$0xff]   ;;  %v3427_v31 = vld [vmem:[#allocation22 + $0x78] sm:$0xff]  }
 0x627   :  { %v1040_v37 = vpack.c.bf16 %v1037_v36, %v1037_v36  ;;  %v1041_v4 = vpack.c.bf16 %v1038_v3, %v1038_v3  ;;  %v3428_v32 = vld [vmem:[#allocation22 + $0x38] sm:$0xff]   ;;  %v3433_v3 = vld [vmem:[%s4733_s16 + $0x20] sm:$0xff]  }
 0x628   :  { %v3430_v63 = vld [vmem:[%s4733_s16 + $0x8] sm:$0xff]  }
 0x629   :  { %1571 = vmatprep.mubr.bf16.mxu0 %v1040_v37  ;;  %1653 = vmatprep.mubr.bf16.mxu1 %v1040_v37 }
 0x62a   :  { %1572 = vmatmul.mubr.bf16.vlgmr.msra.gmra.mrb[8].mxu0 %v1039_v40  ;;  %1654 = vmatmul.mubr.bf16.vlgmr.msra.gmra.mrb[16].mxu1 %v1039_v40 }
 0x62b   :  { %1581 = vmatpush1.bf16.msra.mxu0 %v3373_v38  ;;  %3112 = vmatpush3.bf16.msra.mxu1 %v3376_v39  ;;  %v1138_v38 = vld [vmem:[#allocation21] sm:$0x7] }
 0x62c   :  { %1582 = vmatprep.subr.bf16.mxu0 %v3379_v41  ;;  %3113 = vmatprep.subr.bf16.mxu1 %v3989_v0  ;;  %v1151_v39 = vrot.slane %v1138_v38, %v816_v51  ;;  %v1143_v40 = vrot.slane %v1138_v38, %v4574_v18  ;;  %v1147_v41 = vrot.slane %v1138_v38, %v4577_v20  ;;  %v3443_v38 = vld [vmem:[#allocation30 + $0x14] ss:$8 sps:$4 sm:$0xff]  }
 0x62d   :  { %1612 = vmatprep.mubr.bf16.mxu0 %v3991_v17  ;;  %3127 = vmatprep.mubr.msk.bf16.mxu1 %vm3990_vm0, %v3989_v0 }
 0x62f   :  { %1583 = vmatpush1.bf16.msra.mxu0 %v3377_v42  ;;  %3114 = vmatpush3.bf16.msra.mxu1 %v3380_v43 }
 0x630   :  { %1584 = vmatprep.subr.bf16.mxu0 %v3383_v44  ;;  %3115 = vmatprep.subr.bf16.mxu1 %v3989_v0 }
 0x633   :  { %1585 = vmatpush1.bf16.msra.mxu0 %v3381_v45  ;;  %3116 = vmatpush3.bf16.msra.mxu1 %v3384_v46 }
 0x634   :  { %1586 = vmatprep.subr.bf16.mxu0 %v3387_v47  ;;  %3117 = vmatprep.subr.bf16.mxu1 %v3989_v0 }
 0x637   :  { %1587 = vmatpush1.bf16.msra.mxu0 %v3385_v48  ;;  %3118 = vmatpush3.bf16.msra.mxu1 %v3388_v49 }
 0x638   :  { %1588 = vmatprep.subr.bf16.mxu0 %v3391_v50  ;;  %3119 = vmatprep.subr.bf16.mxu1 %v3989_v0 }
 0x63b   :  { %1589 = vmatpush1.bf16.msra.mxu0 %v3389_v52  ;;  %3120 = vmatpush3.bf16.msra.mxu1 %v3392_v53 }
 0x63c   :  { %1590 = vmatprep.subr.bf16.mxu0 %v3395_v54  ;;  %3121 = vmatprep.subr.bf16.mxu1 %v3989_v0 }
 0x63f   :  { %1591 = vmatpush1.bf16.msra.mxu0 %v3393_v56  ;;  %3122 = vmatpush3.bf16.msra.mxu1 %v3396_v57 }
 0x640   :  { %1592 = vmatprep.subr.bf16.mxu0 %v3399_v58  ;;  %3123 = vmatprep.subr.bf16.mxu1 %v3989_v0 }
 0x643   :  { %1593 = vmatpush1.bf16.msra.mxu0 %v3397_v60  ;;  %3124 = vmatpush3.bf16.msra.mxu1 %v3400_v61  ;;  %v3429_v61 = vld [vmem:[%s4733_s16] sm:$0xff]  }
 0x644   :  { %1594 = vmatprep.subr.bf16.mxu0 %v3403_v62  ;;  %3125 = vmatprep.subr.bf16.mxu1 %v3989_v0 }
 0x647   :  { %1595 = vmatpush1.bf16.msra.mxu0 %v3401_v1  ;;  %3126 = vmatpush3.bf16.msra.mxu1 %v3404_v2  ;;  %v3431_v1 = vld [vmem:[%s4733_s16 + $0x10] sm:$0xff]   ;;  %v3432_v2 = vld [vmem:[%s4733_s16 + $0x18] sm:$0xff]  }
 0x648   :  { %3131 = vmatprep.subr.bf16.mxu0 %v3989_v0  ;;  %2945 = vmatprep.subr.bf16.mxu1 %v3406_v6  ;;  %v3436_v6 = vld [vmem:[%s4733_s16 + $0x38] sm:$0xff]  }
 0x64a   :  { %1613 = vmatmul.mubr.bf16.vlgmr.msra.gmra.mrb[8].mxu0 %v1041_v4  ;;  %3128 = vmatmul.mubr.bf16.vlgmr.msra.gmra.mrb[20].mxu1 %v1041_v4  ;;  %v3434_v4 = vld [vmem:[%s4733_s16 + $0x28] sm:$0xff]  }
 0x64b   :  { %3147 = vmatprep.mubr.msk.bf16.mxu0 %vm3990_vm0, %v3989_v0  ;;  %3132 = vmatpush3.bf16.msra.mxu0 %v3405_v5  ;;  %v3435_v5 = vld [vmem:[%s4733_s16 + $0x30] sm:$0xff]  }
 0x64c   :  { %2946 = vmatpush3.bf16.msra.mxu1 %v3407_v7  ;;  %3133 = vmatprep.subr.bf16.mxu0 %v3989_v0 }
 0x64d   :  { %2947 = vmatprep.subr.bf16.mxu1 %v3409_v8 }
 0x64f   :  { %3134 = vmatpush3.bf16.msra.mxu0 %v3408_v9 }
 0x650   :  { %2948 = vmatpush3.bf16.msra.mxu1 %v3410_v10  ;;  %3135 = vmatprep.subr.bf16.mxu0 %v3989_v0 }
 0x651   :  { %2949 = vmatprep.subr.bf16.mxu1 %v3412_v11  ;;  %v2797_v11 = vld [vmem:[#allocation24] ss:$0 sm:$0xff] }
 0x653   :  { %3136 = vmatpush3.bf16.msra.mxu0 %v3411_v12 }
 0x654   :  { %2950 = vmatpush3.bf16.msra.mxu1 %v3413_v13  ;;  %3137 = vmatprep.subr.bf16.mxu0 %v3989_v0 }
 0x655   :  { %2951 = vmatprep.subr.bf16.mxu1 %v3415_v14 }
 0x657   :  { %3138 = vmatpush3.bf16.msra.mxu0 %v3414_v15 }
 0x658   :  { %2952 = vmatpush3.bf16.msra.mxu1 %v3416_v19  ;;  %3139 = vmatprep.subr.bf16.mxu0 %v3989_v0 }
 0x659   :  { %2953 = vmatprep.subr.bf16.mxu1 %v3418_v21 }
 0x65b   :  { %3140 = vmatpush3.bf16.msra.mxu0 %v3417_v22 }
 0x65c   :  { %2954 = vmatpush3.bf16.msra.mxu1 %v3419_v23  ;;  %3141 = vmatprep.subr.bf16.mxu0 %v3989_v0 }
 0x65d   :  { %2955 = vmatprep.subr.bf16.mxu1 %v3421_v24 }
 0x65f   :  { %3142 = vmatpush3.bf16.msra.mxu0 %v3420_v25 }
 0x660   :  { %2956 = vmatpush3.bf16.msra.mxu1 %v3422_v26  ;;  %3143 = vmatprep.subr.bf16.mxu0 %v3989_v0  ;;  %v3437_v26 = vld [vmem:[#allocation27] sm:$0xff]  }
 0x661   :  { %2957 = vmatprep.subr.bf16.mxu1 %v3424_v28  ;;  %v2822_v28 = vld [vmem:[#allocation25] ss:$0 sm:$0xff] }
 0x663   :  { %3144 = vmatpush3.bf16.msra.mxu0 %v3423_v27  ;;  %v3440_v27 = vld [vmem:[#allocation30 + $0x4] ss:$8 sps:$4 sm:$0xff]  }
 0x664   :  { %3145 = vmatprep.subr.bf16.mxu0 %v3989_v0  ;;  %2958 = vmatpush3.bf16.msra.mxu1 %v3425_v29 }
 0x665   :  { %2959 = vmatprep.subr.bf16.mxu1 %v3427_v31 }
 0x667   :  { %3146 = vmatpush3.bf16.msra.mxu0 %v3426_v30 }
 0x668   :  { %3171 = vmatprep.subr.bf16.mxu0 %v3989_v0  ;;  %2960 = vmatpush3.bf16.msra.mxu1 %v3428_v32 }
 0x669   :  { %3151 = vmatprep.subr.bf16.mxu1 %v3989_v0 }
 0x6fd   :  { %v2930_v33 = vpop.f32.mrb[16].mxu1 }
 0x6fe   :  { %v2931_v34 = vpop.f32.mrb[17].mxu1 }
 0x6ff   :  { %v2932_v35 = vadd.f32 %v2931_v34, %v2930_v33  ;;  %v2933_v36 = vpop.f32.mrb[18].mxu1 }
 0x700   :  { %v2934_v37 = vpop.f32.mrb[19].mxu1  ;;  %v3438_v36 = vld [vmem:[#allocation30] ss:$8 sps:$4 sm:$0xff]  }
 0x701   :  { %v1656_v42 = vadd.f32 %v2932_v35, %v1151_v39  ;;  %v3441_v39 = vld [vmem:[#allocation30 + $0x10] ss:$8 sps:$4 sm:$0xff]  }
 0x71d   :  { %v1614_v43 = vpop.f32.mrb[8].mxu0  ;;  %v1695_v44 = vpop.f32.mrb[20].mxu1 }
 0x71e   :  { %v3209_v45 = vadd.f32 %v1614_v43, %v1143_v40  ;;  %v1696_v46 = vadd.f32 %v1695_v44, %v1656_v42  ;;  %v1616_v47 = vpop.f32.mrb[9].mxu0  ;;  %v3129_v48 = vpop.f32.mrb[21].mxu1  ;;  %v3446_v40 = vld [vmem:[#allocation30 + $0x24] ss:$8 sps:$4 sm:$0xff]   ;;  %v3449_v42 = vld [vmem:[#allocation30 + $0x34] ss:$8 sps:$4 sm:$0xff]  }
 0x71f   :  { %v3210_v49 = vadd.f32 %v1616_v47, %v1147_v41  ;;  %v1618_v50 = vpop.f32.mrb[10].mxu0  ;;  %v1698_v52 = vpop.f32.mrb[22].mxu1  ;;  %v3444_v41 = vld [vmem:[#allocation30 + $0x20] ss:$8 sps:$4 sm:$0xff]   ;;  %v3447_v43 = vld [vmem:[#allocation30 + $0x30] ss:$8 sps:$4 sm:$0xff]  }
 0x720   :  { %vm1701_vm10 = vcmp.gt.f32.partialorder %v3209_v45, 0.0  ;;  %v1704_v53 = vmul.f32 0.01, %v3209_v45  ;;  %vm1703_vm11 = vcmp.gt.f32.partialorder %v1696_v46, 0.0  ;;  %v1706_v54 = vmul.f32 0.01, %v1696_v46 }
 0x721   :  { %vm1702_vm12 = vcmp.gt.f32.partialorder %v3210_v49, 0.0  ;;  %v1705_v16 = vmul.f32 0.01, %v3210_v49  ;;  %v1619_v51 = vpop.f32.mrb[11].mxu0  ;;  %v3130_v55 = vpop.f32.mrb[23].mxu1  ;;  %v2170_v44 = vld [vmem:[#allocation4] sm:$0xff] }
 0x722   :  { %v1707_v56 = vsel %vm1701_vm10, %v3209_v45, %v1704_v53  ;;  %v1709_v57 = vsel %vm1703_vm11, %v1696_v46, %v1706_v54  ;;  %v3450_v45 = vld [vmem:[#allocation31 + $0x40] sm:$0xff]   ;;  %v2171_v46 = vpack.c.bf16 %v2170_v44, %v2170_v44  ;;  %v3452_v48 = vld [vmem:[#allocation31 + $0x48] sm:$0xff]   ;;  %v3455_v50 = vld [vmem:[#allocation31 + $0x10] sm:$0xff]  }
 0x723   :  { %v1712_v58 = vpack.c.bf16 %v1709_v57, %v1709_v57  ;;  %v1708_v59 = vsel %vm1702_vm12, %v3210_v49, %v1705_v16  ;;  %v1710_v62 = vpack.c.bf16 %v1707_v56, %v1707_v56  ;;  %v3451_v47 = vld [vmem:[#allocation31] sm:$0xff]   ;;  %v3454_v49 = vld [vmem:[#allocation31 + $0x50] sm:$0xff]   ;;  %v3456_v52 = vld [vmem:[#allocation31 + $0x58] sm:$0xff]  }
 0x724   :  { %v1711_v60 = vpack.c.bf16 %v1708_v59, %v1708_v59  ;;  %v3457_v53 = vld [vmem:[#allocation31 + $0x18] sm:$0xff]   ;;  %v3458_v54 = vld [vmem:[#allocation31 + $0x60] sm:$0xff]   ;;  %v3460_v51 = vld [vmem:[#allocation31 + $0x68] sm:$0xff]  }
 0x725   :  { %3148 = vmatmul.mubr.bf16.vlgmr.msra.gmra.mrb[12].mxu0 %v1712_v58  ;;  %v3459_v16 = vld [vmem:[#allocation31 + $0x20] sm:$0xff]   ;;  %v3461_v55 = vld [vmem:[#allocation31 + $0x28] sm:$0xff]   ;;  %v3462_v56 = vld [vmem:[#allocation31 + $0x70] sm:$0xff]  }
 0x726   :  { %1944 = vmatprep.mubr.bf16.mxu1 %v1711_v60  ;;  %3173 = vmatprep.mubr.msk.bf16.mxu0 %vm3990_vm0, %v3989_v0  ;;  %v3463_v57 = vld [vmem:[#allocation31 + $0x30] sm:$0xff]   ;;  %v3464_v58 = vld [vmem:[#allocation31 + $0x78] sm:$0xff]   ;;  %v3466_v60 = vld [vmem:[%s4741_s24] sm:$0xff]  }
 0x727   :  { %1945 = vmatmul.mubr.bf16.vlgmr.msra.gmra.mrb[24].mxu1 %v1710_v62  ;;  %3172 = vmatpush3.bf16.msra.mxu0 %v3437_v26  ;;  %v3465_v59 = vld [vmem:[#allocation31 + $0x38] sm:$0xff]  }
 0x728   :  { %3152 = vmatpush3.bf16.msra.mxu1 %v3429_v61  ;;  %3167 = vmatprep.mubr.msk.bf16.mxu1 %vm3990_vm0, %v3989_v0  ;;  %v3467_v61 = vld [vmem:[%s4741_s24 + $0x8] sm:$0xff]   ;;  %v3468_v62 = vld [vmem:[%s4741_s24 + $0x10] sm:$0xff]  }
 0x729   :  { %3153 = vmatprep.subr.bf16.mxu1 %v3989_v0  ;;  %2236 = vmatprep.subr.bf16.mxu0 %v3440_v27 }
 0x72c   :  { %3154 = vmatpush3.bf16.msra.mxu1 %v3430_v63  ;;  %v3469_v63 = vld [vmem:[%s4741_s24 + $0x18] sm:$0xff]  }
 0x72d   :  { %3155 = vmatprep.subr.bf16.mxu1 %v3989_v0 }
 0x730   :  { %3156 = vmatpush3.bf16.msra.mxu1 %v3431_v1  ;;  %v3470_v1 = vld [vmem:[%s4741_s24 + $0x20] sm:$0xff]  }
 0x731   :  { %3157 = vmatprep.subr.bf16.mxu1 %v3989_v0 }
 0x734   :  { %3158 = vmatpush3.bf16.msra.mxu1 %v3432_v2  ;;  %v3471_v2 = vld [vmem:[%s4741_s24 + $0x28] sm:$0xff]  }
 0x735   :  { %3159 = vmatprep.subr.bf16.mxu1 %v3989_v0 }
 0x738   :  { %3160 = vmatpush3.bf16.msra.mxu1 %v3433_v3  ;;  %v2180_v3 = vld [vmem:[%s4738_s21] sm:$0x3] }
 0x739   :  { %3161 = vmatprep.subr.bf16.mxu1 %v3989_v0 }
 0x73c   :  { %3162 = vmatpush3.bf16.msra.mxu1 %v3434_v4  ;;  %v2185_v4 = vrot.slane %v2180_v3, %v4574_v18  ;;  %v3472_v18 = vld [vmem:[%s4741_s24 + $0x30] sm:$0xff]  }
 0x73d   :  { %3163 = vmatprep.subr.bf16.mxu1 %v3989_v0 }
 0x740   :  { %3164 = vmatpush3.bf16.msra.mxu1 %v3435_v5  ;;  %v2189_v5 = vrot.slane %v2180_v3, %v4577_v20  ;;  %v3473_v20 = vld [vmem:[%s4741_s24 + $0x38] sm:$0xff]  }
 0x741   :  { %3165 = vmatprep.subr.bf16.mxu1 %v3989_v0 }
 0x744   :  { %3166 = vmatpush3.bf16.msra.mxu1 %v3436_v6 }
 0x745   :  { %3177 = vmatprep.subr.bf16.mxu1 %v3989_v0 }
 0x7f8   :  { %v1986_v7 = vpop.f32.mrb[12].mxu0 }
 0x7f9   :  { %v3149_v8 = vpop.f32.mrb[13].mxu0 }
 0x7fa   :  { %v2961_v9 = vpop.f32.mrb[24].mxu1  ;;  %v1989_v10 = vpop.f32.mrb[14].mxu0 }
 0x7fb   :  { %v2962_v12 = vpop.f32.mrb[25].mxu1  ;;  %v3150_v13 = vpop.f32.mrb[15].mxu0 }
 0x7fc   :  { %v2963_v14 = vadd.f32 %v2962_v12, %v2961_v9  ;;  %v2964_v15 = vpop.f32.mrb[26].mxu1 }
 0x7fd   :  { %v2965_v19 = vpop.f32.mrb[27].mxu1 }
 0x7fe   :  { %v1947_v21 = vadd.f32 %v2963_v14, %v2797_v11  ;;  %v3474_v19 = vld [vmem:[%s4743_s26] sm:$0xff]  }
 0x800   :  { %v1987_v22 = vadd.f32 %v1986_v7, %v1947_v21  ;;  %v3475_v21 = vld [vmem:[%s4743_s26 + $0x8] sm:$0xff]  }
 0x802   :  { %vm1992_vm13 = vcmp.gt.f32.partialorder %v1987_v22, 0.0  ;;  %v1993_v23 = vmul.f32 0.01, %v1987_v22 }
 0x804   :  { %v1994_v24 = vsel %vm1992_vm13, %v1987_v22, %v1993_v23  ;;  %v2843_v23 = vld [vmem:[#allocation33] ss:$0 sm:$0xff] }
 0x805   :  { %v1995_v25 = vpack.c.bf16 %v1994_v24, %v1994_v24 }
 0x807   :  { %3168 = vmatmul.mubr.bf16.vlgmr.msra.gmra.mrb[28].mxu1 %v1995_v25 }
 0x808   :  { %3193 = vmatprep.mubr.msk.bf16.mxu1 %vm3990_vm0, %v3989_v0  ;;  %3178 = vmatpush3.bf16.msra.mxu1 %v3466_v60 }
 0x809   :  { %3179 = vmatprep.subr.bf16.mxu1 %v3989_v0 }
 0x80c   :  { %3180 = vmatpush3.bf16.msra.mxu1 %v3467_v61 }
 0x80d   :  { %3181 = vmatprep.subr.bf16.mxu1 %v3989_v0 }
 0x810   :  { %3182 = vmatpush3.bf16.msra.mxu1 %v3468_v62 }
 0x811   :  { %3183 = vmatprep.subr.bf16.mxu1 %v3989_v0 }
 0x814   :  { %3184 = vmatpush3.bf16.msra.mxu1 %v3469_v63 }
 0x815   :  { %3185 = vmatprep.subr.bf16.mxu1 %v3989_v0 }
 0x818   :  { %3186 = vmatpush3.bf16.msra.mxu1 %v3470_v1 }
 0x819   :  { %3187 = vmatprep.subr.bf16.mxu1 %v3989_v0 }
 0x81c   :  { %3188 = vmatpush3.bf16.msra.mxu1 %v3471_v2 }
 0x81d   :  { %3189 = vmatprep.subr.bf16.mxu1 %v3989_v0 }
 0x820   :  { %3190 = vmatpush3.bf16.msra.mxu1 %v3472_v18 }
 0x821   :  { %3191 = vmatprep.subr.bf16.mxu1 %v3989_v0 }
 0x824   :  { %3192 = vmatpush3.bf16.msra.mxu1 %v3473_v20 }
 0x8da   :  { %v2101_v29 = vpop.f32.mrb[28].mxu1 }
 0x8db   :  { %v2102_v30 = vadd.f32 %v2822_v28, %v2101_v29  ;;  %v3169_v31 = vpop.f32.mrb[29].mxu1 }
 0x8dc   :  { %v2104_v32 = vpop.f32.mrb[30].mxu1  ;;  %v3476_v31 = vld [vmem:[%s4743_s26 + $0x10] sm:$0xff]  }
 0x8dd   :  { %vm2107_vm14 = vcmp.gt.f32.partialorder %v2102_v30, 0.0  ;;  %v2108_v33 = vmul.f32 0.01, %v2102_v30  ;;  %v3170_v34 = vpop.f32.mrb[31].mxu1  ;;  %v3477_v32 = vld [vmem:[%s4743_s26 + $0x18] sm:$0xff]  }
 0x8df   :  { %v2109_v35 = vsel %vm2107_vm14, %v2102_v30, %v2108_v33  ;;  %v2860_v33 = vld [vmem:[%s4742_s25] ss:$0 sm:$0xff] }
 0x8e0   :  { %v2110_v37 = vpack.c.bf16 %v2109_v35, %v2109_v35 }
 0x8e2   :  { %3174 = vmatmul.mubr.msk.bf16.vlgmr.msra.gmra.mrb[16].mxu0 %vm2126_vm15, %v2110_v37 }
 0x8e3   :  { %2237 = vmatpush1.bf16.msra.mxu0 %v3438_v36  ;;  %2268 = vmatprep.mubr.bf16.mxu0 %v3991_v17  ;;  %v3453_v17 = vld [vmem:[#allocation31 + $0x8] sm:$0xff]  }
 0x8e4   :  { %2238 = vmatprep.subr.bf16.mxu0 %v3443_v38 }
 0x8e7   :  { %2239 = vmatpush1.bf16.msra.mxu0 %v3441_v39 }
 0x8e8   :  { %2240 = vmatprep.subr.bf16.mxu0 %v3446_v40 }
 0x8eb   :  { %2241 = vmatpush1.bf16.msra.mxu0 %v3444_v41  ;;  %v2831_v41 = vld [vmem:[#allocation28] ss:$0 sm:$0xff] }
 0x8ec   :  { %2242 = vmatprep.subr.bf16.mxu0 %v3449_v42 }
 0x8ef   :  { %2243 = vmatpush1.bf16.msra.mxu0 %v3447_v43 }
 0x8f0   :  { %2987 = vmatprep.subr.bf16.mxu0 %v3450_v45 }
 0x8f2   :  { %2842 = vmatmul.mubr.msk.bf16.vlgmr.msra.gmra.mrb[20].mxu0 %vm2232_vm1, %v2171_v46 }
 0x8f3   :  { %2988 = vmatpush3.bf16.msra.mxu0 %v3451_v47 }
 0x8f4   :  { %2989 = vmatprep.subr.bf16.mxu0 %v3452_v48 }
 0x8f7   :  { %2990 = vmatpush3.bf16.msra.mxu0 %v3453_v17 }
 0x8f8   :  { %2991 = vmatprep.subr.bf16.mxu0 %v3454_v49 }
 0x8fb   :  { %2992 = vmatpush3.bf16.msra.mxu0 %v3455_v50 }
 0x8fc   :  { %2993 = vmatprep.subr.bf16.mxu0 %v3456_v52 }
 0x8ff   :  { %2994 = vmatpush3.bf16.msra.mxu0 %v3457_v53 }
 0x900   :  { %2995 = vmatprep.subr.bf16.mxu0 %v3458_v54 }
 0x903   :  { %2996 = vmatpush3.bf16.msra.mxu0 %v3459_v16 }
 0x904   :  { %2997 = vmatprep.subr.bf16.mxu0 %v3460_v51 }
 0x907   :  { %2998 = vmatpush3.bf16.msra.mxu0 %v3461_v55 }
 0x908   :  { %2999 = vmatprep.subr.bf16.mxu0 %v3462_v56 }
 0x90b   :  { %3000 = vmatpush3.bf16.msra.mxu0 %v3463_v57 }
 0x90c   :  { %3001 = vmatprep.subr.bf16.mxu0 %v3464_v58 }
 0x90f   :  { %3002 = vmatpush3.bf16.msra.mxu0 %v3465_v59 }
 0x910   :  { %3197 = vmatprep.subr.bf16.mxu0 %v3989_v0 }
 0x9c5   :  { %v2270_v6 = vpop.f32.mrb[20].mxu0 }
 0x9c6   :  { %v2271_v7 = vadd.f32 %v2270_v6, %v2185_v4  ;;  %v2272_v8 = vpop.f32.mrb[21].mxu0 }
 0x9c7   :  { %v2273_v9 = vadd.f32 %v2272_v8, %v2189_v5  ;;  %v2274_v10 = vpop.f32.mrb[22].mxu0 }
 0x9c8   :  { %v2277_v11 = vmax.f32 %v2271_v7, 0.0  ;;  %v2275_v12 = vpop.f32.mrb[23].mxu0 }
 0x9c9   :  { %v2278_v13 = vmax.f32 %v2273_v9, 0.0 }
 0x9ca   :  { %v2279_v15 = vpack.c.bf16 %v2277_v11, %v2277_v11 }
 0x9cb   :  { %v2280_v14 = vpack.c.bf16 %v2278_v13, %v2278_v13 }
 0x9cd   :  { %2448 = vmatprep.mubr.bf16.mxu0 %v2280_v14 }
 0x9ce   :  { %2449 = vmatmul.mubr.bf16.vlgmr.msra.gmra.mrb[24].mxu0 %v2279_v15 }
 0x9cf   :  { %3205 = vmatprep.mubr.msk.bf16.mxu0 %vm3990_vm0, %v3989_v0  ;;  %3198 = vmatpush3.bf16.msra.mxu0 %v3474_v19 }
 0x9d0   :  { %3199 = vmatprep.subr.bf16.mxu0 %v3989_v0 }
 0x9d3   :  { %3200 = vmatpush3.bf16.msra.mxu0 %v3475_v21 }
 0x9d4   :  { %3201 = vmatprep.subr.bf16.mxu0 %v3989_v0 }
 0x9d7   :  { %3202 = vmatpush3.bf16.msra.mxu0 %v3476_v31 }
 0x9d8   :  { %3203 = vmatprep.subr.bf16.mxu0 %v3989_v0  ;;  %v2869_v0 = vld [vmem:[%s4787_s0] ss:$0 sm:$0xff] }
 0x9d9   :  { %v3211_v42 = vadd.f32 %v2869_v0, %v2831_v41 }
 0x9db   :  { %3204 = vmatpush3.bf16.msra.mxu0 %v3477_v32 }
 0xaa1   :  { %v3003_v22 = vpop.f32.mrb[24].mxu0 }
 0xaa2   :  { %v3004_v24 = vpop.f32.mrb[25].mxu0 }
 0xaa3   :  { %v3005_v25 = vadd.f32 %v3004_v24, %v3003_v22  ;;  %v3006_v26 = vpop.f32.mrb[26].mxu0 }
 0xaa4   :  { %v3007_v27 = vpop.f32.mrb[27].mxu0 }
 0xaa5   :  { %v2451_v28 = vadd.f32 %v3005_v25, %v2843_v23 }
 0xaa7   :  { %v2456_v29 = vmax.f32 %v2451_v28, 0.0 }
 0xaa9   :  { %v2457_v30 = vpack.c.bf16 %v2456_v29, %v2456_v29 }
 0xaab   :  { %3194 = vmatmul.mubr.bf16.vlgmr.msra.gmra.mrb[32].mxu1 %v2457_v30 }
 0xb7e   :  { %v2563_v34 = vpop.f32.mrb[32].mxu1 }
 0xb7f   :  { %v2564_v35 = vadd.f32 %v2860_v33, %v2563_v34  ;;  %v3195_v36 = vpop.f32.mrb[33].mxu1 }
 0xb80   :  { %v2566_v37 = vpop.f32.mrb[34].mxu1 }
 0xb81   :  { %v2569_v38 = vmax.f32 %v2564_v35, 0.0  ;;  %v3196_v39 = vpop.f32.mrb[35].mxu1 }
 0xb83   :  { %v2570_v40 = vpack.c.bf16 %v2569_v38, %v2569_v38 }
 0xb85   :  { %3206 = vmatmul.mubr.msk.bf16.vlgmr.msra.gmra.mrb[16].mxu0 %vm2232_vm1, %v2570_v40 }
 0xc58   :  { %v2647_v43 = vpop.f32.mrb[16].mxu0 }
 0xc59   :  { %v3212_v44 = vadd.f32 %v3211_v42, %v2647_v43  ;;  %v3207_v45 = vpop.f32.mrb[17].mxu0 }
 0xc5a   :  { %v2650_v46 = vpop.f32.mrb[18].mxu0 }
 0xc5b   :  { %2654 = vst [vmem:[%s4788_s30] sm:$0xff] %v3212_v44  ;;  %v3208_v47 = vpop.f32.mrb[19].mxu0 }
 0xc5c   :  { %2659 = vsyncpa [#allocation3], 1 }
 0xc5d   :  { %2660 = vsyncpa [#allocation5], 1 }
 0xc5e   :  { %2661 = vsyncpa [#allocation8], 1 }
 0xc5f   :  { %2662 = vsyncpa [#allocation11], 1 }
 0xc60   :  { %2663 = vsyncpa [#allocation14], 1 }
 0xc61   :  { %2664 = vsyncpa [#allocation17], 1 }
 0xc62   :  { %2665 = vsyncpa [#allocation20], 1 }
 0xc63   :  { %2666 = vsyncpa [#allocation23], 1 }
 0xc64   :  { %2667 = vsyncpa [#allocation26], 1 }
 0xc65   :  { %2668 = vsyncpa [#allocation29], 1 }
 0xc66   :  { %2669 = vsyncpa [#allocation32], 1 }

</bundles_post_ra>
